<compile_context>
chip_gen: v6e
topology: v6e:2x2x1
jax: 0.10.0
libtpu: 0.0.40
codegen_flags: <defaults>
</compile_context>

<pallas_src>
import functools

import jax
import jax.numpy as jnp
from jax.experimental import pallas as pl
from jax.experimental.pallas import tpu as pltpu


def _round_up(x: int, m: int) -> int:
    return ((x + m - 1) // m) * m


def _cdiv(a: int, b: int) -> int:
    return (a + b - 1) // b


def _deep_ritz_kernel(x_ref, wb_ref, bb_ref, wo_ref, bo_ref, o_ref, xpad_ref,
                      *, n_blocks: int, n_layers: int, in_dim: int,
                      out_dim: int, act_dtype):
    """One batch tile of the DeepRitzNet forward.

    x_ref   : (TB, in_dim)      raw (unpadded) input rows
    wb_ref  : (L, Hp, Hp)       per-layer Linear weights, (in, out) layout
    bb_ref  : (L, 1, Hp)        per-layer Linear biases (f32, lane-padded)
    wo_ref  : (Hp, Op)          output Linear weight, (in, out) layout
    bo_ref  : (1, Op)           output Linear bias (f32, lane-padded)
    o_ref   : (out_dim, TB)     transposed, lane-dense output tile
    xpad_ref: (TB, Hp) f32      scratch slab for the ZeroPadLayer
    """
    mdt = wb_ref.dtype  # matmul operand dtype (f32 or bf16)

    # ZeroPadLayer: write x into the first in_dim lanes of a zeroed slab.
    xpad_ref[...] = jnp.zeros_like(xpad_ref)
    xpad_ref[:, :in_dim] = x_ref[...].astype(xpad_ref.dtype)
    x = xpad_ref[...]                                       # (TB, Hp) f32

    def block_body(b, x):
        x0 = x                                              # residual (f32)

        def layer_body(l, x):
            idx = b * n_layers + l
            y = jnp.dot(x.astype(mdt), wb_ref[idx],
                        preferred_element_type=jnp.float32) + bb_ref[idx]
            # RitzActivation: relu(y)^3. Done in act_dtype (bf16 halves VALU
            # work on v6e/v7x); residual stream / accumulation stay f32.
            r = jnp.maximum(y, 0.0).astype(act_dtype)
            return (r * r * r).astype(jnp.float32)

        x = jax.lax.fori_loop(0, n_layers, layer_body, x, unroll=True)
        return x + x0

    x = jax.lax.fori_loop(0, n_blocks, block_body, x, unroll=True)

    out = jnp.dot(x.astype(mdt), wo_ref[...],
                  preferred_element_type=jnp.float32) + bo_ref[...]  # (TB, Op)
    # Store only the useful columns, transposed to a lane-dense (out_dim, TB)
    # tile: ~Op/out_dim less output HBM traffic than the padded slab.
    o_ref[...] = out.T[:out_dim, :].astype(o_ref.dtype)


def prepare_params(params, *, hid_dim, out_dim, n_blocks, n_layers,
                   compute_dtype=jnp.float32):
    """Pre-transpose (out,in)->(in,out) and lane-pad all parameters.

    compute_dtype=jnp.bfloat16 puts matmul operands in bf16 (MXU-native on
    v5e/v6e/v7x and halves resident weight VMEM); biases stay f32.
    """
    wb, bb, wo, bo = params       # wb (L,H,H) out-in; bb (L,H); wo (O,H); bo (O,)
    L = n_blocks * n_layers
    Hp = _round_up(hid_dim, 128)
    Op = _round_up(out_dim, 128)

    wb_t = jnp.zeros((L, Hp, Hp), compute_dtype)
    wb_t = wb_t.at[:, :hid_dim, :hid_dim].set(
        jnp.transpose(wb, (0, 2, 1)).astype(compute_dtype))
    bb_p = jnp.zeros((L, 1, Hp), jnp.float32).at[:, 0, :hid_dim].set(bb)
    wo_t = jnp.zeros((Hp, Op), compute_dtype).at[:hid_dim, :out_dim].set(
        wo.T.astype(compute_dtype))
    bo_p = jnp.zeros((1, Op), jnp.float32).at[0, :out_dim].set(bo)
    return wb_t, bb_p, wo_t, bo_p


def deep_ritz_forward(x, prepared, *, in_dim, out_dim, n_blocks, n_layers,
                      block_b=1024, act_dtype=jnp.float32):
    """Run the Pallas kernel over a batch of points. Returns (B, out_dim) f32."""
    wb, bb, wo, bo = prepared
    B, xin = x.shape
    assert xin == in_dim
    L, Hp = wb.shape[0], wb.shape[-1]
    Op = wo.shape[-1]
    assert in_dim <= Hp

    # Batch tiling: large tiles (amortize ~0.35us/grid-step overhead), minimal
    # padding waste, and an even >=2 step count so the "parallel" axis keeps
    # both v7x TensorCores busy.
    n_tiles = max(_cdiv(B, block_b), 2 if B > 8 else 1)
    if n_tiles > 1 and n_tiles % 2:
        n_tiles += 1
    TB = _round_up(_cdiv(B, n_tiles), 8)
    Bp = _round_up(B, TB)
    num_tiles = Bp // TB
    if Bp != B:
        x = jnp.zeros((Bp, in_dim), x.dtype).at[:B].set(x)

    # Explicit scoped-VMEM budget: single-buffered resident weights +
    # double-buffered I/O tiles + live activation slabs, with headroom.
    weight_bytes = sum(int(a.size) * a.dtype.itemsize for a in (wb, bb, wo, bo))
    io_bytes = 2 * TB * in_dim * x.dtype.itemsize + 2 * out_dim * TB * 4
    act_bytes = 8 * TB * Hp * 4
    vmem_limit = int(min(max(int(1.5 * (weight_bytes + io_bytes + act_bytes))
                             + (4 << 20), 32 << 20), 64 << 20))

    kernel = functools.partial(_deep_ritz_kernel, n_blocks=n_blocks,
                               n_layers=n_layers, in_dim=in_dim,
                               out_dim=out_dim, act_dtype=act_dtype)

    def run(single_buffer_weights: bool):
        # Grid-invariant weights: single-buffer to halve resident VMEM.
        wkw = ({"pipeline_mode": pl.Buffered(1)}
               if single_buffer_weights else {})
        grid_spec = pltpu.PrefetchScalarGridSpec(
            num_scalar_prefetch=0,
            grid=(num_tiles,),
            in_specs=[
                pl.BlockSpec((TB, in_dim), lambda i: (i, 0)),        # x tile
                pl.BlockSpec((L, Hp, Hp), lambda i: (0, 0, 0), **wkw),
                pl.BlockSpec((L, 1, Hp), lambda i: (0, 0, 0), **wkw),
                pl.BlockSpec((Hp, Op), lambda i: (0, 0), **wkw),
                pl.BlockSpec((1, Op), lambda i: (0, 0), **wkw),
            ],
            out_specs=pl.BlockSpec((None, out_dim, TB), lambda i: (i, 0, 0)),
            scratch_shapes=[pltpu.VMEM((TB, Hp), jnp.float32)],
        )
        return pl.pallas_call(
            kernel,
            out_shape=jax.ShapeDtypeStruct((num_tiles, out_dim, TB),
                                           jnp.float32),
            grid_spec=grid_spec,
            compiler_params=pltpu.CompilerParams(
                dimension_semantics=("parallel",),   # megacore batch sharding
                vmem_limit_bytes=vmem_limit),
        )(x, wb, bb, wo, bo)

    try:
        out = run(True)
    except Exception:
        # Fallback if this jax build rejects pipeline_mode=pl.Buffered(1) on
        # the grid-invariant weight specs; use default double-buffering.
        out = run(False)

    # (num_tiles, out_dim, TB) -> (B, out_dim)
    out = jnp.transpose(out, (0, 2, 1)).reshape(Bp, out_dim)
    return out[:B]


def init_params(key, *, hid_dim, out_dim, n_blocks, n_layers):
    """PyTorch-layout params, uniform +/- 1/sqrt(fan_in) init."""
    L = n_blocks * n_layers
    k1, k2, k3, k4 = jax.random.split(key, 4)
    bound = 1.0 / jnp.sqrt(hid_dim)
    wb = jax.random.uniform(k1, (L, hid_dim, hid_dim), jnp.float32, -bound, bound)
    bb = jax.random.uniform(k2, (L, hid_dim), jnp.float32, -bound, bound)
    wo = jax.random.uniform(k3, (out_dim, hid_dim), jnp.float32, -bound, bound)
    bo = jax.random.uniform(k4, (out_dim,), jnp.float32, -bound, bound)
    return wb, bb, wo, bo


def deep_ritz_reference(x, params, *, in_dim, hid_dim, out_dim,
                        n_blocks, n_layers):
    """Pure-JAX reference mirroring the PyTorch forward (unpadded, f32)."""
    wb, bb, wo, bo = params
    B = x.shape[0]
    x = jnp.concatenate(
        [x, jnp.zeros((B, hid_dim - in_dim), dtype=x.dtype)], axis=1)
    idx = 0
    for _ in range(n_blocks):
        x0 = x
        for _ in range(n_layers):
            y = x @ wb[idx].T + bb[idx]
            x = jnp.maximum(y, 0.0) ** 3
            idx += 1
        x = x + x0
    return x @ wo.T + bo


if __name__ == "__main__":
    # Small, module-consistent shapes: 2-D PDE input, hidden width 32.
    in_dim, hid_dim, out_dim = 2, 32, 1
    n_blocks, n_layers = 2, 2
    B = 64

    key = jax.random.PRNGKey(0)
    kx, kp = jax.random.split(key)
    x = jax.random.normal(kx, (B, in_dim), dtype=jnp.float32)
    params = init_params(kp, hid_dim=hid_dim, out_dim=out_dim,
                         n_blocks=n_blocks, n_layers=n_layers)

    ref = deep_ritz_reference(x, params, in_dim=in_dim, hid_dim=hid_dim,
                              out_dim=out_dim, n_blocks=n_blocks,
                              n_layers=n_layers)

    # f32 matmuls + f32 activation math (checked against the reference).
    # Tiling picks 2 batch tiles of 32 rows -> exercises the multi-tile grid.
    prepared = prepare_params(params, hid_dim=hid_dim, out_dim=out_dim,
                              n_blocks=n_blocks, n_layers=n_layers,
                              compute_dtype=jnp.float32)
    out = deep_ritz_forward(x, prepared, in_dim=in_dim, out_dim=out_dim,
                            n_blocks=n_blocks, n_layers=n_layers)
    out = jax.block_until_ready(out)
    assert out.shape == (B, out_dim)
    assert jnp.allclose(out, ref, atol=1e-4, rtol=1e-4)

    # bf16 matmul operands + bf16 relu^3 (v6e/v7x VALU-friendly path),
    # f32 accumulation and f32 residual stream. Keep f32 path for v5e /
    # accuracy-sensitive use.
    prepared_bf16 = prepare_params(params, hid_dim=hid_dim, out_dim=out_dim,
                                   n_blocks=n_blocks, n_layers=n_layers,
                                   compute_dtype=jnp.bfloat16)
    out_bf16 = deep_ritz_forward(x, prepared_bf16, in_dim=in_dim,
                                 out_dim=out_dim, n_blocks=n_blocks,
                                 n_layers=n_layers, act_dtype=jnp.bfloat16)
    out_bf16 = jax.block_until_ready(out_bf16)
    assert out_bf16.shape == (B, out_dim)
    assert bool(jnp.all(jnp.isfinite(out_bf16)))

    print("KERNEL_OK")
</pallas_src>

<mosaic_0001>
module attributes {stable_mosaic.version = 11 : i64} {
  func.func @_deep_ritz_kernel(%arg0: i32, %arg1: memref<32x2xf32, #tpu.memory_space<vmem>>, %arg2: memref<4x128x128xf32, #tpu.memory_space<vmem>>, %arg3: memref<4x1x128xf32, #tpu.memory_space<vmem>>, %arg4: memref<128x128xf32, #tpu.memory_space<vmem>>, %arg5: memref<1x128xf32, #tpu.memory_space<vmem>>, %arg6: memref<1x1x32xf32, #tpu.memory_space<vmem>>, %arg7: memref<32x128xf32, #tpu.memory_space<vmem>>) attributes {dimension_semantics = [#tpu.dimension_semantics<parallel>], iteration_bounds = array<i64: 2>, scalar_prefetch = 0 : i64, scratch_operands = 1 : i64, tpu.core_type = #tpu.core_type<tc>, window_params = [{transform_indices = @transform_0, window_bounds = array<i64: 32, 2>}, {pipeline_mode = #tpu.pipeline_mode<synchronous>, transform_indices = @transform_1, window_bounds = array<i64: 4, 128, 128>}, {pipeline_mode = #tpu.pipeline_mode<synchronous>, transform_indices = @transform_2, window_bounds = array<i64: 4, 1, 128>}, {pipeline_mode = #tpu.pipeline_mode<synchronous>, transform_indices = @transform_3, window_bounds = array<i64: 128, 128>}, {pipeline_mode = #tpu.pipeline_mode<synchronous>, transform_indices = @transform_4, window_bounds = array<i64: 1, 128>}, {transform_indices = @transform_5, window_bounds = array<i64: 1, 1, 32>}]} {
    %cst = arith.constant 0.000000e+00 : f32
    %0 = vector.broadcast %cst : f32 to vector<32x128xf32>
    %c0 = arith.constant 0 : index
    %c0_0 = arith.constant 0 : index
    %1 = vector.load %arg7[%c0, %c0_0] : memref<32x128xf32, #tpu.memory_space<vmem>>, vector<32x128xf32>
    tpu.vector_store %arg7[%c0, %c0_0], %0 {strides = array<i32>} : memref<32x128xf32, #tpu.memory_space<vmem>>, vector<32x128xf32>,
    %c0_1 = arith.constant 0 : index
    %c0_2 = arith.constant 0 : index
    %2 = vector.load %arg1[%c0_1, %c0_2] : memref<32x2xf32, #tpu.memory_space<vmem>>, vector<32x2xf32>
    %c0_3 = arith.constant 0 : index
    %c0_4 = arith.constant 0 : index
    %3 = vector.load %arg7[%c0_3, %c0_4] : memref<32x128xf32, #tpu.memory_space<vmem>>, vector<32x2xf32>
    tpu.vector_store %arg7[%c0_3, %c0_4], %2 {strides = array<i32>} : memref<32x128xf32, #tpu.memory_space<vmem>>, vector<32x2xf32>,
    %c0_5 = arith.constant 0 : index
    %c0_6 = arith.constant 0 : index
    %4 = vector.load %arg7[%c0_5, %c0_6] : memref<32x128xf32, #tpu.memory_space<vmem>>, vector<32x128xf32>
    %c0_i32 = arith.constant 0 : i32
    %c0_i32_7 = arith.constant 0 : i32
    %c2_i32 = arith.constant 2 : i32
    %5 = arith.muli %c0_i32, %c2_i32 : i32
    %6 = arith.addi %5, %c0_i32_7 : i32
    %7 = arith.index_cast %6 : i32 to index
    %c0_8 = arith.constant 0 : index
    %c0_9 = arith.constant 0 : index
    %8 = vector.load %arg2[%7, %c0_8, %c0_9] : memref<4x128x128xf32, #tpu.memory_space<vmem>>, vector<1x128x128xf32>
    %9 = vector.shape_cast %8 : vector<1x128x128xf32> to vector<128x128xf32>
    %cst_10 = arith.constant dense<0.000000e+00> : vector<32x128xf32>
    %10 = tpu.matmul %4, %9, %cst_10 {dimension_numbers = #tpu.dot_dimension_numbers<[1], [0], [0], [1], [0, 0, 1, 1], [], []>} : vector<32x128xf32>, vector<128x128xf32>, vector<32x128xf32> -> vector<32x128xf32>
    %11 = arith.index_cast %6 : i32 to index
    %c0_11 = arith.constant 0 : index
    %c0_12 = arith.constant 0 : index
    %12 = vector.load %arg3[%11, %c0_11, %c0_12] : memref<4x1x128xf32, #tpu.memory_space<vmem>>, vector<1x1x128xf32>
    %13 = vector.shape_cast %12 : vector<1x1x128xf32> to vector<1x128xf32>
    %14 = vector.broadcast %13 : vector<1x128xf32> to vector<32x128xf32>
    %15 = arith.addf %10, %14 : vector<32x128xf32>
    %cst_13 = arith.constant 0.000000e+00 : f32
    %16 = vector.broadcast %cst_13 : f32 to vector<32x128xf32>
    %17 = arith.maximumf %15, %16 : vector<32x128xf32>
    %18 = arith.mulf %17, %17 : vector<32x128xf32>
    %19 = arith.mulf %18, %17 : vector<32x128xf32>
    %c1_i32 = arith.constant 1 : i32
    %c2_i32_14 = arith.constant 2 : i32
    %20 = arith.muli %c0_i32, %c2_i32_14 : i32
    %21 = arith.addi %20, %c1_i32 : i32
    %22 = arith.index_cast %21 : i32 to index
    %c0_15 = arith.constant 0 : index
    %c0_16 = arith.constant 0 : index
    %23 = vector.load %arg2[%22, %c0_15, %c0_16] : memref<4x128x128xf32, #tpu.memory_space<vmem>>, vector<1x128x128xf32>
    %24 = vector.shape_cast %23 : vector<1x128x128xf32> to vector<128x128xf32>
    %cst_17 = arith.constant dense<0.000000e+00> : vector<32x128xf32>
    %25 = tpu.matmul %19, %24, %cst_17 {dimension_numbers = #tpu.dot_dimension_numbers<[1], [0], [0], [1], [0, 0, 1, 1], [], []>} : vector<32x128xf32>, vector<128x128xf32>, vector<32x128xf32> -> vector<32x128xf32>
    %26 = arith.index_cast %21 : i32 to index
    %c0_18 = arith.constant 0 : index
    %c0_19 = arith.constant 0 : index
    %27 = vector.load %arg3[%26, %c0_18, %c0_19] : memref<4x1x128xf32, #tpu.memory_space<vmem>>, vector<1x1x128xf32>
    %28 = vector.shape_cast %27 : vector<1x1x128xf32> to vector<1x128xf32>
    %29 = vector.broadcast %28 : vector<1x128xf32> to vector<32x128xf32>
    %30 = arith.addf %25, %29 : vector<32x128xf32>
    %cst_20 = arith.constant 0.000000e+00 : f32
    %31 = vector.broadcast %cst_20 : f32 to vector<32x128xf32>
    %32 = arith.maximumf %30, %31 : vector<32x128xf32>
    %33 = arith.mulf %32, %32 : vector<32x128xf32>
    %34 = arith.mulf %33, %32 : vector<32x128xf32>
    %c2_i32_21 = arith.constant 2 : i32
    %35 = arith.addf %34, %4 : vector<32x128xf32>
    %c1_i32_22 = arith.constant 1 : i32
    %c0_i32_23 = arith.constant 0 : i32
    %c2_i32_24 = arith.constant 2 : i32
    %36 = arith.muli %c1_i32_22, %c2_i32_24 : i32
    %37 = arith.addi %36, %c0_i32_23 : i32
    %38 = arith.index_cast %37 : i32 to index
    %c0_25 = arith.constant 0 : index
    %c0_26 = arith.constant 0 : index
    %39 = vector.load %arg2[%38, %c0_25, %c0_26] : memref<4x128x128xf32, #tpu.memory_space<vmem>>, vector<1x128x128xf32>
    %40 = vector.shape_cast %39 : vector<1x128x128xf32> to vector<128x128xf32>
    %cst_27 = arith.constant dense<0.000000e+00> : vector<32x128xf32>
    %41 = tpu.matmul %35, %40, %cst_27 {dimension_numbers = #tpu.dot_dimension_numbers<[1], [0], [0], [1], [0, 0, 1, 1], [], []>} : vector<32x128xf32>, vector<128x128xf32>, vector<32x128xf32> -> vector<32x128xf32>
    %42 = arith.index_cast %37 : i32 to index
    %c0_28 = arith.constant 0 : index
    %c0_29 = arith.constant 0 : index
    %43 = vector.load %arg3[%42, %c0_28, %c0_29] : memref<4x1x128xf32, #tpu.memory_space<vmem>>, vector<1x1x128xf32>
    %44 = vector.shape_cast %43 : vector<1x1x128xf32> to vector<1x128xf32>
    %45 = vector.broadcast %44 : vector<1x128xf32> to vector<32x128xf32>
    %46 = arith.addf %41, %45 : vector<32x128xf32>
    %cst_30 = arith.constant 0.000000e+00 : f32
    %47 = vector.broadcast %cst_30 : f32 to vector<32x128xf32>
    %48 = arith.maximumf %46, %47 : vector<32x128xf32>
    %49 = arith.mulf %48, %48 : vector<32x128xf32>
    %50 = arith.mulf %49, %48 : vector<32x128xf32>
    %c1_i32_31 = arith.constant 1 : i32
    %c2_i32_32 = arith.constant 2 : i32
    %51 = arith.muli %c1_i32_22, %c2_i32_32 : i32
    %52 = arith.addi %51, %c1_i32_31 : i32
    %53 = arith.index_cast %52 : i32 to index
    %c0_33 = arith.constant 0 : index
    %c0_34 = arith.constant 0 : index
    %54 = vector.load %arg2[%53, %c0_33, %c0_34] : memref<4x128x128xf32, #tpu.memory_space<vmem>>, vector<1x128x128xf32>
    %55 = vector.shape_cast %54 : vector<1x128x128xf32> to vector<128x128xf32>
    %cst_35 = arith.constant dense<0.000000e+00> : vector<32x128xf32>
    %56 = tpu.matmul %50, %55, %cst_35 {dimension_numbers = #tpu.dot_dimension_numbers<[1], [0], [0], [1], [0, 0, 1, 1], [], []>} : vector<32x128xf32>, vector<128x128xf32>, vector<32x128xf32> -> vector<32x128xf32>
    %57 = arith.index_cast %52 : i32 to index
    %c0_36 = arith.constant 0 : index
    %c0_37 = arith.constant 0 : index
    %58 = vector.load %arg3[%57, %c0_36, %c0_37] : memref<4x1x128xf32, #tpu.memory_space<vmem>>, vector<1x1x128xf32>
    %59 = vector.shape_cast %58 : vector<1x1x128xf32> to vector<1x128xf32>
    %60 = vector.broadcast %59 : vector<1x128xf32> to vector<32x128xf32>
    %61 = arith.addf %56, %60 : vector<32x128xf32>
    %cst_38 = arith.constant 0.000000e+00 : f32
    %62 = vector.broadcast %cst_38 : f32 to vector<32x128xf32>
    %63 = arith.maximumf %61, %62 : vector<32x128xf32>
    %64 = arith.mulf %63, %63 : vector<32x128xf32>
    %65 = arith.mulf %64, %63 : vector<32x128xf32>
    %c2_i32_39 = arith.constant 2 : i32
    %66 = arith.addf %65, %35 : vector<32x128xf32>
    %c2_i32_40 = arith.constant 2 : i32
    %c0_41 = arith.constant 0 : index
    %c0_42 = arith.constant 0 : index
    %67 = vector.load %arg4[%c0_41, %c0_42] : memref<128x128xf32, #tpu.memory_space<vmem>>, vector<128x128xf32>
    %cst_43 = arith.constant dense<0.000000e+00> : vector<32x128xf32>
    %68 = tpu.matmul %66, %67, %cst_43 {dimension_numbers = #tpu.dot_dimension_numbers<[1], [0], [0], [1], [0, 0, 1, 1], [], []>} : vector<32x128xf32>, vector<128x128xf32>, vector<32x128xf32> -> vector<32x128xf32>
    %c0_44 = arith.constant 0 : index
    %c0_45 = arith.constant 0 : index
    %69 = vector.load %arg5[%c0_44, %c0_45] : memref<1x128xf32, #tpu.memory_space<vmem>>, vector<1x128xf32>
    %70 = vector.broadcast %69 : vector<1x128xf32> to vector<32x128xf32>
    %71 = arith.addf %68, %70 : vector<32x128xf32>
    %72 = tpu.transpose %71, [1, 0] : vector<32x128xf32> -> vector<128x32xf32>
    %73 = vector.extract_strided_slice %72 {offsets = [0, 0], sizes = [1, 32], strides = [1, 1]} : vector<128x32xf32> to vector<1x32xf32>
    %c0_46 = arith.constant 0 : index
    %c0_47 = arith.constant 0 : index
    %c0_48 = arith.constant 0 : index
    %74 = vector.load %arg6[%c0_46, %c0_47, %c0_48] : memref<1x1x32xf32, #tpu.memory_space<vmem>>, vector<1x1x32xf32>
    %75 = vector.shape_cast %74 : vector<1x1x32xf32> to vector<1x32xf32>
    %76 = vector.shape_cast %73 : vector<1x32xf32> to vector<1x1x32xf32>
    tpu.vector_store %arg6[%c0_46, %c0_47, %c0_48], %76 {strides = array<i32>} : memref<1x1x32xf32, #tpu.memory_space<vmem>>, vector<1x1x32xf32>,
    return
  }
  func.func @transform_0(%arg0: i32) -> (i32, i32) {
    %c0_i32 = arith.constant 0 : i32
    %c0_i32_0 = arith.constant 0 : i32
    return %arg0, %c0_i32 : i32, i32
  }
  func.func @transform_1(%arg0: i32) -> (i32, i32, i32) {
    %c0_i32 = arith.constant 0 : i32
    %c0_i32_0 = arith.constant 0 : i32
    %c0_i32_1 = arith.constant 0 : i32
    %c0_i32_2 = arith.constant 0 : i32
    return %c0_i32, %c0_i32_0, %c0_i32_1 : i32, i32, i32
  }
  func.func @transform_2(%arg0: i32) -> (i32, i32, i32) {
    %c0_i32 = arith.constant 0 : i32
    %c0_i32_0 = arith.constant 0 : i32
    %c0_i32_1 = arith.constant 0 : i32
    %c0_i32_2 = arith.constant 0 : i32
    return %c0_i32, %c0_i32_0, %c0_i32_1 : i32, i32, i32
  }
  func.func @transform_3(%arg0: i32) -> (i32, i32) {
    %c0_i32 = arith.constant 0 : i32
    %c0_i32_0 = arith.constant 0 : i32
    %c0_i32_1 = arith.constant 0 : i32
    return %c0_i32, %c0_i32_0 : i32, i32
  }
  func.func @transform_4(%arg0: i32) -> (i32, i32) {
    %c0_i32 = arith.constant 0 : i32
    %c0_i32_0 = arith.constant 0 : i32
    %c0_i32_1 = arith.constant 0 : i32
    return %c0_i32, %c0_i32_0 : i32, i32
  }
  func.func @transform_5(%arg0: i32) -> (i32, i32, i32) {
    %c0_i32 = arith.constant 0 : i32
    %c0_i32_0 = arith.constant 0 : i32
    %c0_i32_1 = arith.constant 0 : i32
    return %arg0, %c0_i32, %c0_i32_0 : i32, i32, i32
  }
}

module attributes {stable_mosaic.version = 11 : i64} {
  func.func @_deep_ritz_kernel(%arg0: i32, %arg1: memref<32x2xf32, #tpu.memory_space<vmem>>, %arg2: memref<4x128x128xf32, #tpu.memory_space<vmem>>, %arg3: memref<4x1x128xf32, #tpu.memory_space<vmem>>, %arg4: memref<128x128xf32, #tpu.memory_space<vmem>>, %arg5: memref<1x128xf32, #tpu.memory_space<vmem>>, %arg6: memref<1x1x32xf32, #tpu.memory_space<vmem>>, %arg7: memref<32x128xf32, #tpu.memory_space<vmem>>) attributes {dimension_semantics = [#tpu.dimension_semantics<parallel>], iteration_bounds = array<i64: 2>, scalar_prefetch = 0 : i64, scratch_operands = 1 : i64, tpu.core_type = #tpu.core_type<tc>, window_params = [{transform_indices = @transform_0, window_bounds = array<i64: 32, 2>}, {pipeline_mode = #tpu.pipeline_mode<synchronous>, transform_indices = @transform_1, window_bounds = array<i64: 4, 128, 128>}, {pipeline_mode = #tpu.pipeline_mode<synchronous>, transform_indices = @transform_2, window_bounds = array<i64: 4, 1, 128>}, {pipeline_mode = #tpu.pipeline_mode<synchronous>, transform_indices = @transform_3, window_bounds = array<i64: 128, 128>}, {pipeline_mode = #tpu.pipeline_mode<synchronous>, transform_indices = @transform_4, window_bounds = array<i64: 1, 128>}, {transform_indices = @transform_5, window_bounds = array<i64: 1, 1, 32>}]} {
    %cst = arith.constant 0.000000e+00 : f32
    %0 = vector.broadcast %cst : f32 to vector<32x128xf32>
    %c0 = arith.constant 0 : index
    %c0_0 = arith.constant 0 : index
    %1 = vector.load %arg7[%c0, %c0_0] : memref<32x128xf32, #tpu.memory_space<vmem>>, vector<32x128xf32>
    tpu.vector_store %arg7[%c0, %c0_0], %0 {strides = array<i32>} : memref<32x128xf32, #tpu.memory_space<vmem>>, vector<32x128xf32>,
    %c0_1 = arith.constant 0 : index
    %c0_2 = arith.constant 0 : index
    %2 = vector.load %arg1[%c0_1, %c0_2] : memref<32x2xf32, #tpu.memory_space<vmem>>, vector<32x2xf32>
    %c0_3 = arith.constant 0 : index
    %c0_4 = arith.constant 0 : index
    %3 = vector.load %arg7[%c0_3, %c0_4] : memref<32x128xf32, #tpu.memory_space<vmem>>, vector<32x2xf32>
    tpu.vector_store %arg7[%c0_3, %c0_4], %2 {strides = array<i32>} : memref<32x128xf32, #tpu.memory_space<vmem>>, vector<32x2xf32>,
    %c0_5 = arith.constant 0 : index
    %c0_6 = arith.constant 0 : index
    %4 = vector.load %arg7[%c0_5, %c0_6] : memref<32x128xf32, #tpu.memory_space<vmem>>, vector<32x128xf32>
    %c0_i32 = arith.constant 0 : i32
    %c0_i32_7 = arith.constant 0 : i32
    %c2_i32 = arith.constant 2 : i32
    %5 = arith.muli %c0_i32, %c2_i32 : i32
    %6 = arith.addi %5, %c0_i32_7 : i32
    %7 = arith.index_cast %6 : i32 to index
    %c0_8 = arith.constant 0 : index
    %c0_9 = arith.constant 0 : index
    %8 = vector.load %arg2[%7, %c0_8, %c0_9] : memref<4x128x128xf32, #tpu.memory_space<vmem>>, vector<1x128x128xf32>
    %9 = vector.shape_cast %8 : vector<1x128x128xf32> to vector<128x128xf32>
    %cst_10 = arith.constant dense<0.000000e+00> : vector<32x128xf32>
    %10 = tpu.matmul %4, %9, %cst_10 {dimension_numbers = #tpu.dot_dimension_numbers<[1], [0], [0], [1], [0, 0, 1, 1], [], []>} : vector<32x128xf32>, vector<128x128xf32>, vector<32x128xf32> -> vector<32x128xf32>
    %11 = arith.index_cast %6 : i32 to index
    %c0_11 = arith.constant 0 : index
    %c0_12 = arith.constant 0 : index
    %12 = vector.load %arg3[%11, %c0_11, %c0_12] : memref<4x1x128xf32, #tpu.memory_space<vmem>>, vector<1x1x128xf32>
    %13 = vector.shape_cast %12 : vector<1x1x128xf32> to vector<1x128xf32>
    %14 = vector.broadcast %13 : vector<1x128xf32> to vector<32x128xf32>
    %15 = arith.addf %10, %14 : vector<32x128xf32>
    %cst_13 = arith.constant 0.000000e+00 : f32
    %16 = vector.broadcast %cst_13 : f32 to vector<32x128xf32>
    %17 = arith.maximumf %15, %16 : vector<32x128xf32>
    %18 = arith.mulf %17, %17 : vector<32x128xf32>
    %19 = arith.mulf %18, %17 : vector<32x128xf32>
    %c1_i32 = arith.constant 1 : i32
    %c2_i32_14 = arith.constant 2 : i32
    %20 = arith.muli %c0_i32, %c2_i32_14 : i32
    %21 = arith.addi %20, %c1_i32 : i32
    %22 = arith.index_cast %21 : i32 to index
    %c0_15 = arith.constant 0 : index
    %c0_16 = arith.constant 0 : index
    %23 = vector.load %arg2[%22, %c0_15, %c0_16] : memref<4x128x128xf32, #tpu.memory_space<vmem>>, vector<1x128x128xf32>
    %24 = vector.shape_cast %23 : vector<1x128x128xf32> to vector<128x128xf32>
    %cst_17 = arith.constant dense<0.000000e+00> : vector<32x128xf32>
    %25 = tpu.matmul %19, %24, %cst_17 {dimension_numbers = #tpu.dot_dimension_numbers<[1], [0], [0], [1], [0, 0, 1, 1], [], []>} : vector<32x128xf32>, vector<128x128xf32>, vector<32x128xf32> -> vector<32x128xf32>
    %26 = arith.index_cast %21 : i32 to index
    %c0_18 = arith.constant 0 : index
    %c0_19 = arith.constant 0 : index
    %27 = vector.load %arg3[%26, %c0_18, %c0_19] : memref<4x1x128xf32, #tpu.memory_space<vmem>>, vector<1x1x128xf32>
    %28 = vector.shape_cast %27 : vector<1x1x128xf32> to vector<1x128xf32>
    %29 = vector.broadcast %28 : vector<1x128xf32> to vector<32x128xf32>
    %30 = arith.addf %25, %29 : vector<32x128xf32>
    %cst_20 = arith.constant 0.000000e+00 : f32
    %31 = vector.broadcast %cst_20 : f32 to vector<32x128xf32>
    %32 = arith.maximumf %30, %31 : vector<32x128xf32>
    %33 = arith.mulf %32, %32 : vector<32x128xf32>
    %34 = arith.mulf %33, %32 : vector<32x128xf32>
    %c2_i32_21 = arith.constant 2 : i32
    %35 = arith.addf %34, %4 : vector<32x128xf32>
    %c1_i32_22 = arith.constant 1 : i32
    %c0_i32_23 = arith.constant 0 : i32
    %c2_i32_24 = arith.constant 2 : i32
    %36 = arith.muli %c1_i32_22, %c2_i32_24 : i32
    %37 = arith.addi %36, %c0_i32_23 : i32
    %38 = arith.index_cast %37 : i32 to index
    %c0_25 = arith.constant 0 : index
    %c0_26 = arith.constant 0 : index
    %39 = vector.load %arg2[%38, %c0_25, %c0_26] : memref<4x128x128xf32, #tpu.memory_space<vmem>>, vector<1x128x128xf32>
    %40 = vector.shape_cast %39 : vector<1x128x128xf32> to vector<128x128xf32>
    %cst_27 = arith.constant dense<0.000000e+00> : vector<32x128xf32>
    %41 = tpu.matmul %35, %40, %cst_27 {dimension_numbers = #tpu.dot_dimension_numbers<[1], [0], [0], [1], [0, 0, 1, 1], [], []>} : vector<32x128xf32>, vector<128x128xf32>, vector<32x128xf32> -> vector<32x128xf32>
    %42 = arith.index_cast %37 : i32 to index
    %c0_28 = arith.constant 0 : index
    %c0_29 = arith.constant 0 : index
    %43 = vector.load %arg3[%42, %c0_28, %c0_29] : memref<4x1x128xf32, #tpu.memory_space<vmem>>, vector<1x1x128xf32>
    %44 = vector.shape_cast %43 : vector<1x1x128xf32> to vector<1x128xf32>
    %45 = vector.broadcast %44 : vector<1x128xf32> to vector<32x128xf32>
    %46 = arith.addf %41, %45 : vector<32x128xf32>
    %cst_30 = arith.constant 0.000000e+00 : f32
    %47 = vector.broadcast %cst_30 : f32 to vector<32x128xf32>
    %48 = arith.maximumf %46, %47 : vector<32x128xf32>
    %49 = arith.mulf %48, %48 : vector<32x128xf32>
    %50 = arith.mulf %49, %48 : vector<32x128xf32>
    %c1_i32_31 = arith.constant 1 : i32
    %c2_i32_32 = arith.constant 2 : i32
    %51 = arith.muli %c1_i32_22, %c2_i32_32 : i32
    %52 = arith.addi %51, %c1_i32_31 : i32
    %53 = arith.index_cast %52 : i32 to index
    %c0_33 = arith.constant 0 : index
    %c0_34 = arith.constant 0 : index
    %54 = vector.load %arg2[%53, %c0_33, %c0_34] : memref<4x128x128xf32, #tpu.memory_space<vmem>>, vector<1x128x128xf32>
    %55 = vector.shape_cast %54 : vector<1x128x128xf32> to vector<128x128xf32>
    %cst_35 = arith.constant dense<0.000000e+00> : vector<32x128xf32>
    %56 = tpu.matmul %50, %55, %cst_35 {dimension_numbers = #tpu.dot_dimension_numbers<[1], [0], [0], [1], [0, 0, 1, 1], [], []>} : vector<32x128xf32>, vector<128x128xf32>, vector<32x128xf32> -> vector<32x128xf32>
    %57 = arith.index_cast %52 : i32 to index
    %c0_36 = arith.constant 0 : index
    %c0_37 = arith.constant 0 : index
    %58 = vector.load %arg3[%57, %c0_36, %c0_37] : memref<4x1x128xf32, #tpu.memory_space<vmem>>, vector<1x1x128xf32>
    %59 = vector.shape_cast %58 : vector<1x1x128xf32> to vector<1x128xf32>
    %60 = vector.broadcast %59 : vector<1x128xf32> to vector<32x128xf32>
    %61 = arith.addf %56, %60 : vector<32x128xf32>
    %cst_38 = arith.constant 0.000000e+00 : f32
    %62 = vector.broadcast %cst_38 : f32 to vector<32x128xf32>
    %63 = arith.maximumf %61, %62 : vector<32x128xf32>
    %64 = arith.mulf %63, %63 : vector<32x128xf32>
    %65 = arith.mulf %64, %63 : vector<32x128xf32>
    %c2_i32_39 = arith.constant 2 : i32
    %66 = arith.addf %65, %35 : vector<32x128xf32>
    %c2_i32_40 = arith.constant 2 : i32
    %c0_41 = arith.constant 0 : index
    %c0_42 = arith.constant 0 : index
    %67 = vector.load %arg4[%c0_41, %c0_42] : memref<128x128xf32, #tpu.memory_space<vmem>>, vector<128x128xf32>
    %cst_43 = arith.constant dense<0.000000e+00> : vector<32x128xf32>
    %68 = tpu.matmul %66, %67, %cst_43 {dimension_numbers = #tpu.dot_dimension_numbers<[1], [0], [0], [1], [0, 0, 1, 1], [], []>} : vector<32x128xf32>, vector<128x128xf32>, vector<32x128xf32> -> vector<32x128xf32>
    %c0_44 = arith.constant 0 : index
    %c0_45 = arith.constant 0 : index
    %69 = vector.load %arg5[%c0_44, %c0_45] : memref<1x128xf32, #tpu.memory_space<vmem>>, vector<1x128xf32>
    %70 = vector.broadcast %69 : vector<1x128xf32> to vector<32x128xf32>
    %71 = arith.addf %68, %70 : vector<32x128xf32>
    %72 = tpu.transpose %71, [1, 0] : vector<32x128xf32> -> vector<128x32xf32>
    %73 = vector.extract_strided_slice %72 {offsets = [0, 0], sizes = [1, 32], strides = [1, 1]} : vector<128x32xf32> to vector<1x32xf32>
    %c0_46 = arith.constant 0 : index
    %c0_47 = arith.constant 0 : index
    %c0_48 = arith.constant 0 : index
    %74 = vector.load %arg6[%c0_46, %c0_47, %c0_48] : memref<1x1x32xf32, #tpu.memory_space<vmem>>, vector<1x1x32xf32>
    %75 = vector.shape_cast %74 : vector<1x1x32xf32> to vector<1x32xf32>
    %76 = vector.shape_cast %73 : vector<1x32xf32> to vector<1x1x32xf32>
    tpu.vector_store %arg6[%c0_46, %c0_47, %c0_48], %76 {strides = array<i32>} : memref<1x1x32xf32, #tpu.memory_space<vmem>>, vector<1x1x32xf32>,
    return
  }
  func.func @transform_0(%arg0: i32) -> (i32, i32) {
    %c0_i32 = arith.constant 0 : i32
    %c0_i32_0 = arith.constant 0 : i32
    return %arg0, %c0_i32 : i32, i32
  }
  func.func @transform_1(%arg0: i32) -> (i32, i32, i32) {
    %c0_i32 = arith.constant 0 : i32
    %c0_i32_0 = arith.constant 0 : i32
    %c0_i32_1 = arith.constant 0 : i32
    %c0_i32_2 = arith.constant 0 : i32
    return %c0_i32, %c0_i32_0, %c0_i32_1 : i32, i32, i32
  }
  func.func @transform_2(%arg0: i32) -> (i32, i32, i32) {
    %c0_i32 = arith.constant 0 : i32
    %c0_i32_0 = arith.constant 0 : i32
    %c0_i32_1 = arith.constant 0 : i32
    %c0_i32_2 = arith.constant 0 : i32
    return %c0_i32, %c0_i32_0, %c0_i32_1 : i32, i32, i32
  }
  func.func @transform_3(%arg0: i32) -> (i32, i32) {
    %c0_i32 = arith.constant 0 : i32
    %c0_i32_0 = arith.constant 0 : i32
    %c0_i32_1 = arith.constant 0 : i32
    return %c0_i32, %c0_i32_0 : i32, i32
  }
  func.func @transform_4(%arg0: i32) -> (i32, i32) {
    %c0_i32 = arith.constant 0 : i32
    %c0_i32_0 = arith.constant 0 : i32
    %c0_i32_1 = arith.constant 0 : i32
    return %c0_i32, %c0_i32_0 : i32, i32
  }
  func.func @transform_5(%arg0: i32) -> (i32, i32, i32) {
    %c0_i32 = arith.constant 0 : i32
    %c0_i32_0 = arith.constant 0 : i32
    %c0_i32_1 = arith.constant 0 : i32
    return %arg0, %c0_i32, %c0_i32_0 : i32, i32, i32
  }
}

</mosaic_0001>

<bundles_post_ra>
// kernel: tpu_custom_call.1
= control target key start
LH: loop header
LB: loop body
LE: loop exit
PB: predicated region body
PF: predicated region fallthrough
CT: control target
= control target key end

     0   :  { %10 = vsyncpa [#allocation4], 0  ;;  %s1741_s0 = inlined_call_operand.vmem [shape: f32[64,2], index: 0, kind: input, shape index: {}]   ;;  %s1742_s1 = inlined_call_operand.hbm [shape: f32[4,128,128], index: 1, kind: input, shape index: {}]   ;;  %s1743_s2 = inlined_call_operand.vmem [shape: f32[4,1,128], index: 2, kind: input, shape index: {}]   ;;  %s1744_s3 = inlined_call_operand.hbm [shape: f32[128,128], index: 3, kind: input, shape index: {}]   ;;  %s1745_s4 = inlined_call_operand.vmem [shape: f32[1,128], index: 4, kind: input, shape index: {}]   ;;  %s1746_s5 = inlined_call_operand.hbm [shape: f32[2,1,32], index: 5, kind: output, shape index: {}]  }
   0x1   :  { %11 = vsyncpa [#allocation7], 0 }
   0x2   :  { %12 = vsyncpa [#allocation5], 0 }
   0x3   :  { %14 = vsyncpa [#allocation5 + $0x1], 0  ;;  %s1561_s18 = smov 0   ;;  %s1563_s19 = smov 0  }
   0x4   :  { %s1565_s20 = smov 0   ;;  %s1567_s21 = smov 0  }
   0x5 LB: > { %s1582_s22 = sadd.s32 4294967295, %s1523_s21   ;;  %s997_s23 = sadd.s32 4294967294, %s1523_s21   ;;  %s1523_s21 = sphi %s1567_s21, %s1760_s21   ;;  %s1519_s20 = sphi %s1565_s20, %s1759_s20   ;;  %s1515_s19 = sphi %s1563_s19, %s1758_s19   ;;  %s1511_s18 = sphi %s1561_s18, %s1757_s18  }
   0x6   : > { %s1586_s24 = sadd.s32 1, %s1523_s21   ;;  %s137_s25 = sadd.s32 1, %s1519_s20 }
   0x7   : > { %s134_s26 = ssub.s32 %s1523_s21, %s1586_s24  ;;  %p147_p0 = scmp.ne.s32.totalorder %s1519_s20, %s1515_s19 }
   0x8   : > { %p135_p1 = scmp.eq.s32.totalorder %s134_s26, 0  ;;  %p148_p2 = scmp.eq.s32.totalorder %s1582_s22, 1 }
   0x9   : > { %p153_p3 = scmp.ne.s32.totalorder %s1515_s19, %s1511_s18  ;;  %p154_p4 = scmp.eq.s32.totalorder %s997_s23, 1 }
   0xa   : > { %s1597_s27 = scalar_select %p135_p1, %s1519_s20, %s137_s25  }
   0xb   : > { %p1599_p5 = por %p148_p2, %p147_p0  ;;  %p1603_p6 = por %p154_p4, %p153_p3 }
   0xc   : > { %p998_p7 = scmp.ge.s32.totalorder %s1523_s21, 1  ;;  %p161_p8 = scmp.lt.s32.totalorder %s1523_s21, 3 }
   0xd   : > { %s1749_s29 = scalar_select %p1603_p6, 1, 0 }
   0xe   : > { %p1747_p9 = scmp.eq.s32.totalorder %s1582_s22, 0  ;;  %p1610_p10 = pnand %p998_p7, %p161_p8 }
   0xf   : > { %s1525_s6 = smov [#allocation3]   ;;  %s1526_s9 = smov [#allocation6]  }
  0x10   : > { %s173_s7 = sshll.u32 %s1525_s6, 4  ;;  %p1350_p11 = pneg %p1610_p10  ;;  %s174_s7 = int_to_ptr.vmem [resolvable:$true] %s173_s7 }
  0x11   : > { %s189_s10 = sshll.u32 %s1526_s9, 4  ;;  %s1414_s11 = scalar_lea.vmem %s174_s7, 8192  ;;  %s190_s10 = int_to_ptr.vmem [resolvable:$true] %s189_s10 }
  0x12   : > { %p1618_p12 = pnand %p1747_p9, %p1350_p11  ;;  %p1415_p0 = scmp.ne.s32.totalorder %s174_s7, %s1414_s11 }
  0x13   : > { %p1422_p3 = scmp.lt.s32.totalorder %s174_s7, %s174_s7  ;;  %p1423_p4 = scmp.lt.s32.totalorder %s1414_s11, %s1414_s11 }
  0x14   : > { %p1405_p13 = pneg %p1618_p12 }
  0x15   : > { %p1424_p7 = por %p1423_p4, %p1422_p3 }
  0x16   : > { %p1417_p1 = pnand %p1415_p0, %p1405_p13 }
  0x18   : > { %p1418_p2 = pneg %p1417_p1 }
  0x1a   : > { %p1425_p8 = pnand %p1424_p7, %p1418_p2 }
  0x1c   : > { %1428 = shalt.err (!%p1425_p8)
}
  0x1d   : > { %s1527_s12 = smov 128   ;;  %s1528_s13 = smov 8  }
  0x1e   : > { %1353 = dma.hbm_to_vmem [thread:$0]  (!%p1618_p12), %s1742_s1, 8192, %s174_s7, [#allocation4], %s1527_s12, %s1527_s12, %s1528_s13  }
  0x1f   : > { %s1440_s16 = scalar_lea.vmem %s190_s10, 2048  ;;  %p1448_p9 = scmp.lt.s32.totalorder %s190_s10, %s190_s10 }
  0x20   : > { %p1441_p11 = scmp.ne.s32.totalorder %s190_s10, %s1440_s16  ;;  %p1449_p6 = scmp.lt.s32.totalorder %s1440_s16, %s1440_s16 }
  0x22   : > { %p1443_p0 = pnand %p1441_p11, %p1405_p13  ;;  %p1450_p3 = por %p1449_p6, %p1448_p9 }
  0x24   : > { %p1444_p1 = pneg %p1443_p0 }
  0x26   : > { %p1451_p2 = pnand %p1450_p3, %p1444_p1 }
  0x28   : > { %1454 = shalt.err (!%p1451_p2)
}
  0x29   : > { %1356 = dma.hbm_to_vmem [thread:$0]  (!%p1618_p12), %s1744_s3, 2048, %s190_s10, [#allocation7], %s1527_s12, %s1527_s12, %s1528_s13  }
  0x2a   : > { %217 = sbr.rel (%p1610_p10) target bundleno = 1239 (0x4d7), region = 40  ;;  %p1752_p4 = scmp.eq.s32.totalorder (!%p1610_p10), %s1582_s22, 0 }
  0x2f   : > { %1498 = dma.done.wait (%p1752_p4), [#allocation4], 8192   ;;  %p1753_p13 = pmov %p1752_p4 }
  0x30   : > { %p1754_p7 = pmov %p1752_p4 }
  0x31   : > { %1500 = vsyncadd (%p1753_p13), [#allocation4], 4294959104 }
  0x32   : > { %1502 = dma.done.wait (%p1754_p7), [#allocation7], 2048   ;;  %p1755_p6 = pmov %p1752_p4 }
  0x33   : > { %s1005_s25 = sshll.u32 %s1582_s22, 2  ;;  %v1529_v0 = vmov 0.0   ;;  %v286_v1 = vld [vmem:[#allocation3 + $0x78] sm:$0xff]  ;;  %v285_v2 = vld [vmem:[#allocation3 + $0x70] sm:$0xff]  ;;  %v284_v3 = vld [vmem:[#allocation3 + $0x68] sm:$0xff]  ;;  %vm262_vm0 = vcmask 15360  }
  0x34   : > { %1504 = vsyncadd (%p1755_p6), [#allocation7], 4294965248  ;;  %p249_p9 = scmp.lt.s32.totalorder %s1005_s25, 7  ;;  %254 = vst [vmem:[#allocation2] sm:$0xff] %v1529_v0  ;;  %1118 = vmatprep.subr.mxu0 %v286_v1  ;;  %v283_v4 = vld [vmem:[#allocation3 + $0x60] sm:$0xff]  ;;  %v282_v5 = vld [vmem:[#allocation3 + $0x58] sm:$0xff] }
  0x35   : > { %255 = vst [vmem:[#allocation2 + $0x8] sm:$0xff] %v1529_v0  ;;  %256 = vst [vmem:[#allocation2 + $0x10] sm:$0xff] %v1529_v0  ;;  %1119 = vmatpush3.msra.mxu0 %v286_v1  ;;  %v407_v10 = vld [vmem:[#allocation3 + $0xf8] sm:$0xff]  ;;  %v406_v11 = vld [vmem:[#allocation3 + $0xf0] sm:$0xff]  ;;  %s246_s23 = sand.u32 1, %s1515_s19   ;;  %vm905_vm1 = vcmask 253952  }
  0x36   : > { %257 = vst [vmem:[#allocation2 + $0x18] sm:$0xff] %v1529_v0  ;;  %s1762_s25 = smov (!%p249_p9, %s1005_s25), 7  ;;  %1120 = vmatprep.subr.mxu0 %v285_v2  ;;  %1156 = vmatprep.subr.mxu1 %v407_v10  ;;  %v281_v12 = vld [vmem:[#allocation3 + $0x50] sm:$0xff]  ;;  %v405_v13 = vld [vmem:[#allocation3 + $0xe8] sm:$0xff]  ;;  %v404_v15 = vld [vmem:[#allocation3 + $0xe0] sm:$0xff]  ;;  %s908_s9 = scalar_lea.sflag [#allocation5], %s246_s23 }
  0x37   : > { %s1006_s26 = sshll.u32 %s1762_s25, 3  ;;  %1121 = vmatpush3.msra.mxu0 %v285_v2  ;;  %1157 = vmatpush3.msra.mxu1 %v407_v10  ;;  %v280_v14 = vld [vmem:[#allocation3 + $0x48] sm:$0xff]  ;;  %v279_v16 = vld [vmem:[#allocation3 + $0x40] sm:$0xff]  ;;  %v403_v18 = vld [vmem:[#allocation3 + $0xd8] sm:$0xff]  ;;  %s1015_s25 = sshll.u32 %s1582_s22, 4 }
  0x38   : > { %s252_s7 = scalar_lea.vmem %s1741_s0, %s1006_s26  ;;  %1122 = vmatprep.subr.mxu0 %v284_v3  ;;  %1158 = vmatprep.subr.mxu1 %v406_v11  ;;  %v278_v19 = vld [vmem:[#allocation3 + $0x38] sm:$0xff]  ;;  %v402_v20 = vld [vmem:[#allocation3 + $0xd0] sm:$0xff]  ;;  %v401_v22 = vld [vmem:[#allocation3 + $0xc8] sm:$0xff]  ;;  %s247_s26 = scalar_lea.vmem [#allocation8], %s246_s23 }
  0x39   : > { %v258_v6 = vld [vmem:[%s252_s7] sm:$0xff]  ;;  %v259_v7 = vld [vmem:[%s252_s7 + $0x8] sm:$0xff]  ;;  %1123 = vmatpush3.msra.mxu0 %v284_v3  ;;  %v260_v8 = vld [vmem:[%s252_s7 + $0x10] sm:$0xff]  ;;  %1159 = vmatpush3.msra.mxu1 %v406_v11  ;;  %s920_s30 = sshll.u32 %s247_s26, 4  ;;  %s1706_s8 = scalar_lea.hbm %s1746_s5, %s1015_s25  ;;  %s921_s30 = int_to_ptr.vmem [resolvable:$true] %s920_s30 }
  0x3a   : > { %263 = vst.msk [vmem:[#allocation2] sm:$0xff] %vm262_vm0, %v258_v6  ;;  %264 = vst.msk [vmem:[#allocation2 + $0x8] sm:$0xff] %vm262_vm0, %v259_v7  ;;  %v261_v9 = vld [vmem:[%s252_s7 + $0x18] sm:$0xff]  ;;  %1124 = vmatprep.subr.mxu0 %v283_v4  ;;  %1160 = vmatprep.subr.mxu1 %v405_v13  ;;  %v277_v21 = vld [vmem:[#allocation3 + $0x30] sm:$0xff]  ;;  %s1455_s10 = scalar_lea.vmem %s921_s30, 16  ;;  %s1530_s11 = smov [#allocation8]  }
  0x3b   : > { %265 = vst.msk [vmem:[#allocation2 + $0x10] sm:$0xff] %vm262_vm0, %v260_v8  ;;  %266 = vst.msk [vmem:[#allocation2 + $0x18] sm:$0xff] %vm262_vm0, %v261_v9  ;;  %1125 = vmatpush3.msra.mxu0 %v283_v4  ;;  %1161 = vmatpush3.msra.mxu1 %v405_v13  ;;  %v276_v23 = vld [vmem:[#allocation3 + $0x28] sm:$0xff]  ;;  %v400_v24 = vld [vmem:[#allocation3 + $0xc0] sm:$0xff]  ;;  %p1456_p10 = scmp.ne.s32.totalorder %s921_s30, %s1455_s10  ;;  %s1459_s12 = sshll.u32 %s1530_s11, 4  ;;  %s1460_s12 = int_to_ptr.vmem [resolvable:$false] %s1459_s12 }
  0x3c   : > { %1126 = vmatprep.subr.mxu0 %v282_v5  ;;  %1162 = vmatprep.subr.mxu1 %v404_v15  ;;  %v275_v25 = vld [vmem:[#allocation3 + $0x20] sm:$0xff]  ;;  %v399_v26 = vld [vmem:[#allocation3 + $0xb8] sm:$0xff]  ;;  %v398_v28 = vld [vmem:[#allocation3 + $0xb0] sm:$0xff]  ;;  %s1461_s22 = scalar_lea.vmem %s1460_s12, 32  ;;  %p1462_p11 = scmp.lt.s32.totalorder %s921_s30, %s1460_s12 }
  0x3d   : > { %1127 = vmatpush3.msra.mxu0 %v282_v5  ;;  %1163 = vmatpush3.msra.mxu1 %v404_v15  ;;  %v274_v27 = vld [vmem:[#allocation3 + $0x18] sm:$0xff]  ;;  %v273_v29 = vld [vmem:[#allocation3 + $0x10] sm:$0xff]  ;;  %v272_v30 = vld [vmem:[#allocation3 + $0x8] sm:$0xff]  ;;  %p1457_p12 = pnand %p1456_p10, %p1599_p5  ;;  %p1463_p0 = scmp.lt.s32.totalorder %s1461_s22, %s1455_s10 }
  0x3e   : > { %1128 = vmatprep.subr.mxu0 %v281_v12  ;;  %1164 = vmatprep.subr.mxu1 %v403_v18  ;;  %v271_v31 = vld [vmem:[#allocation3] sm:$0xff]  ;;  %v397_v35 = vld [vmem:[#allocation3 + $0xa8] sm:$0xff]  ;;  %v395_v37 = vld [vmem:[#allocation3 + $0x98] sm:$0xff] }
  0x3f   : > { %1129 = vmatpush3.msra.mxu0 %v281_v12  ;;  %1165 = vmatpush3.msra.mxu1 %v403_v18  ;;  %v396_v36 = vld [vmem:[#allocation3 + $0xa0] sm:$0xff]  ;;  %v394_v38 = vld [vmem:[#allocation3 + $0x90] sm:$0xff]  ;;  %v393_v39 = vld [vmem:[#allocation3 + $0x88] sm:$0xff]  ;;  %p1458_p8 = pneg %p1457_p12  ;;  %p1464_p1 = por %p1463_p0, %p1462_p11 }
  0x40   : > { %1130 = vmatprep.subr.mxu0 %v280_v14  ;;  %1166 = vmatprep.subr.mxu1 %v402_v20  ;;  %v392_v40 = vld [vmem:[#allocation3 + $0x80] sm:$0xff]  ;;  %v533_v41 = vld [vmem:[#allocation3 + $0x178] sm:$0xff]  ;;  %v532_v42 = vld [vmem:[#allocation3 + $0x170] sm:$0xff] }
  0x41   : > { %v1654_v17 = vld [vmem:[#allocation2] sm:$0xff]  ;;  %1131 = vmatpush3.msra.mxu0 %v280_v14  ;;  %1167 = vmatpush3.msra.mxu1 %v402_v20  ;;  %v1657_v32 = vld [vmem:[#allocation2 + $0x8] sm:$0xff]  ;;  %v529_v45 = vld [vmem:[#allocation3 + $0x158] sm:$0xff]  ;;  %p1465_p3 = pnand %p1464_p1, %p1458_p8 }
  0x42   : > { %1150 = vmatprep.mubr.f32.mxu0 %v1654_v17  ;;  %1132 = vmatprep.subr.mxu0 %v279_v16  ;;  %v1659_v33 = vld [vmem:[#allocation2 + $0x10] sm:$0xff]  ;;  %v1663_v34 = vld [vmem:[#allocation2 + $0x18] sm:$0xff]  ;;  %v531_v43 = vld [vmem:[#allocation3 + $0x168] sm:$0xff] }
  0x43   : > { %1133 = vmatpush3.msra.mxu0 %v279_v16  ;;  %1168 = vmatprep.subr.mxu1 %v401_v22  ;;  %v530_v44 = vld [vmem:[#allocation3 + $0x160] sm:$0xff]  ;;  %v528_v46 = vld [vmem:[#allocation3 + $0x150] sm:$0xff]  ;;  %v527_v47 = vld [vmem:[#allocation3 + $0x148] sm:$0xff] }
  0x44   : > { %1134 = vmatprep.subr.mxu0 %v278_v19  ;;  %1169 = vmatpush3.msra.mxu1 %v401_v22  ;;  %v526_v48 = vld [vmem:[#allocation3 + $0x140] sm:$0xff]  ;;  %v525_v49 = vld [vmem:[#allocation3 + $0x138] sm:$0xff]  ;;  %v524_v7 = vld [vmem:[#allocation3 + $0x130] sm:$0xff] }
  0x45   : > { %1135 = vmatpush3.msra.mxu0 %v278_v19  ;;  %1170 = vmatprep.subr.mxu1 %v400_v24  ;;  %v1007_v50 = vld [vmem:[%s1743_s2] ss:$0 sm:$0xff]  ;;  %v523_v8 = vld [vmem:[#allocation3 + $0x128] sm:$0xff]  ;;  %v521_v10 = vld [vmem:[#allocation3 + $0x118] sm:$0xff] }
  0x46   : > { %1136 = vmatprep.subr.mxu0 %v277_v21  ;;  %1171 = vmatpush3.msra.mxu1 %v400_v24  ;;  %v522_v9 = vld [vmem:[#allocation3 + $0x120] sm:$0xff]  ;;  %v520_v11 = vld [vmem:[#allocation3 + $0x110] sm:$0xff]  ;;  %v519_v12 = vld [vmem:[#allocation3 + $0x108] sm:$0xff] }
  0x47   : > { %1137 = vmatpush3.msra.mxu0 %v277_v21  ;;  %1172 = vmatprep.subr.mxu1 %v399_v26  ;;  %v518_v13 = vld [vmem:[#allocation3 + $0x100] sm:$0xff]  ;;  %v655_v14 = vld [vmem:[#allocation3 + $0x1f8] sm:$0xff]  ;;  %v654_v15 = vld [vmem:[#allocation3 + $0x1f0] sm:$0xff] }
  0x48   : > { %1138 = vmatprep.subr.mxu0 %v276_v23  ;;  %1173 = vmatpush3.msra.mxu1 %v399_v26  ;;  %v653_v16 = vld [vmem:[#allocation3 + $0x1e8] sm:$0xff]  ;;  %v652_v18 = vld [vmem:[#allocation3 + $0x1e0] sm:$0xff]  ;;  %v651_v19 = vld [vmem:[#allocation3 + $0x1d8] sm:$0xff] }
  0x49   : > { %1139 = vmatpush3.msra.mxu0 %v276_v23  ;;  %1174 = vmatprep.subr.mxu1 %v398_v28  ;;  %v650_v20 = vld [vmem:[#allocation3 + $0x1d0] sm:$0xff]  ;;  %v649_v21 = vld [vmem:[#allocation3 + $0x1c8] sm:$0xff]  ;;  %v648_v22 = vld [vmem:[#allocation3 + $0x1c0] sm:$0xff] }
  0x4a   : > { %1140 = vmatprep.subr.mxu0 %v275_v25  ;;  %1175 = vmatpush3.msra.mxu1 %v398_v28  ;;  %v647_v23 = vld [vmem:[#allocation3 + $0x1b8] sm:$0xff]  ;;  %v646_v24 = vld [vmem:[#allocation3 + $0x1b0] sm:$0xff] }
  0x4b   : > { %1141 = vmatpush3.msra.mxu0 %v275_v25  ;;  %1176 = vmatprep.subr.mxu1 %v397_v35  ;;  %v1009_v25 = vld [vmem:[%s1743_s2 + $0x1] ss:$0 sm:$0xff] }
  0x4c   : > { %1142 = vmatprep.subr.mxu0 %v274_v27  ;;  %1177 = vmatpush3.msra.mxu1 %v397_v35 }
  0x4d   : > { %1143 = vmatpush3.msra.mxu0 %v274_v27  ;;  %1178 = vmatprep.subr.mxu1 %v396_v36 }
  0x4e   : > { %1144 = vmatprep.subr.mxu0 %v273_v29  ;;  %1179 = vmatpush3.msra.mxu1 %v396_v36 }
  0x4f   : > { %1145 = vmatpush3.msra.mxu0 %v273_v29  ;;  %1180 = vmatprep.subr.mxu1 %v395_v37 }
  0x50   : > { %1146 = vmatprep.subr.mxu0 %v272_v30  ;;  %1181 = vmatpush3.msra.mxu1 %v395_v37 }
  0x51   : > { %1147 = vmatpush3.msra.mxu0 %v272_v30  ;;  %1182 = vmatprep.subr.mxu1 %v394_v38 }
  0x52   : > { %1148 = vmatprep.subr.mxu0 %v271_v31  ;;  %1183 = vmatpush3.msra.mxu1 %v394_v38 }
  0x53   : > { %1149 = vmatpush3.msra.mxu0 %v271_v31  ;;  %1184 = vmatprep.subr.mxu1 %v393_v39 }
  0x54   : > { %1151 = vmatmul.mubr.f32.vlgmr.msra.gmra.mxu0 %v1657_v32  ;;  %1185 = vmatpush3.msra.mxu1 %v393_v39 }
  0x55   : > { %1153 = vmatprep.mubr.f32.mxu0 %v1659_v33  ;;  %1186 = vmatprep.subr.mxu1 %v392_v40 }
  0x56   : > { %1187 = vmatpush3.msra.mxu1 %v392_v40  ;;  %1194 = vmatprep.subr.mxu0 %v533_v41 }
  0x57   : > { %1195 = vmatpush3.msra.mxu0 %v533_v41  ;;  %1232 = vmatprep.subr.mxu1 %v655_v14 }
  0x58   : > { %1154 = vmatmul.mubr.f32.gmra.mxu0 %v1663_v34  ;;  %1196 = vmatprep.subr.mxu0 %v532_v42 }
  0x59   : > { %1197 = vmatpush3.msra.mxu0 %v532_v42 }
  0x5a   : > { %1198 = vmatprep.subr.mxu0 %v531_v43 }
  0x5b   : > { %1199 = vmatpush3.msra.mxu0 %v531_v43 }
  0x5c   : > { %1200 = vmatprep.subr.mxu0 %v530_v44 }
  0x5d   : > { %1201 = vmatpush3.msra.mxu0 %v530_v44 }
  0x5e   : > { %1202 = vmatprep.subr.mxu0 %v529_v45 }
  0x5f   : > { %1203 = vmatpush3.msra.mxu0 %v529_v45 }
  0x60   : > { %1204 = vmatprep.subr.mxu0 %v528_v46 }
  0x61   : > { %1205 = vmatpush3.msra.mxu0 %v528_v46 }
  0x62   : > { %1206 = vmatprep.subr.mxu0 %v527_v47 }
  0x63   : > { %1207 = vmatpush3.msra.mxu0 %v527_v47 }
  0x64   : > { %1208 = vmatprep.subr.mxu0 %v526_v48 }
  0x65   : > { %1209 = vmatpush3.msra.mxu0 %v526_v48 }
  0x66   : > { %1210 = vmatprep.subr.mxu0 %v525_v49 }
  0x67   : > { %1211 = vmatpush3.msra.mxu0 %v525_v49 }
  0x68   : > { %1212 = vmatprep.subr.mxu0 %v524_v7 }
  0x69   : > { %1213 = vmatpush3.msra.mxu0 %v524_v7 }
  0x6a   : > { %1214 = vmatprep.subr.mxu0 %v523_v8 }
  0x6b   : > { %1215 = vmatpush3.msra.mxu0 %v523_v8 }
  0x6c   : > { %1216 = vmatprep.subr.mxu0 %v522_v9 }
  0x6d   : > { %1217 = vmatpush3.msra.mxu0 %v522_v9 }
  0x6e   : > { %1218 = vmatprep.subr.mxu0 %v521_v10 }
  0x6f   : > { %1219 = vmatpush3.msra.mxu0 %v521_v10 }
  0x70   : > { %1220 = vmatprep.subr.mxu0 %v520_v11 }
  0x71   : > { %1221 = vmatpush3.msra.mxu0 %v520_v11 }
  0x72   : > { %1222 = vmatprep.subr.mxu0 %v519_v12 }
  0x73   : > { %1223 = vmatpush3.msra.mxu0 %v519_v12 }
  0x74   : > { %1224 = vmatprep.subr.mxu0 %v518_v13 }
  0x75   : > { %1225 = vmatpush3.msra.mxu0 %v518_v13 }
 0x114   : > { %v1152_v51 = vpop.f32.mrf.mxu0 }
 0x115   : > { %v366_v52 = vadd.f32 %v1152_v51, %v1007_v50 }
 0x116   : > { %v360_v53 = vpop.f32.mrf.mxu0 }
 0x117   : > { %v380_v54 = vmax.f32 %v366_v52, 0.0  ;;  %v361_v55 = vadd.f32 %v1007_v50, %v360_v53  ;;  %v643_v53 = vld [vmem:[#allocation3 + $0x198] sm:$0xff] }
 0x118   : > { %v1155_v56 = vpop.f32.mrf.mxu0 }
 0x119   : > { %v379_v57 = vmax.f32 %v361_v55, 0.0  ;;  %v376_v58 = vadd.f32 %v1155_v56, %v1007_v50  ;;  %v384_v59 = vmul.f32 %v380_v54, %v380_v54  ;;  %v780_v55 = vld [vmem:[#allocation6 + $0x78] sm:$0xff]  ;;  %v779_v56 = vld [vmem:[#allocation6 + $0x70] sm:$0xff] }
 0x11a   : > { %v370_v60 = vpop.f32.mrf.mxu0  ;;  %1270 = vmatprep.subr.mxu0 %v780_v55 }
 0x11b   : > { %v382_v61 = vmax.f32 %v376_v58, 0.0  ;;  %v371_v62 = vadd.f32 %v1007_v50, %v370_v60  ;;  %v383_v63 = vmul.f32 %v379_v57, %v379_v57  ;;  %v388_v3 = vmul.f32 %v384_v59, %v380_v54  ;;  %v642_v54 = vld [vmem:[#allocation3 + $0x190] sm:$0xff]  ;;  %v777_v58 = vld [vmem:[#allocation6 + $0x60] sm:$0xff]  ;;  %v776_v59 = vld [vmem:[#allocation6 + $0x58] sm:$0xff] }
 0x11c   : > { %v775_v60 = vld [vmem:[#allocation6 + $0x50] sm:$0xff] }
 0x11d   : > { %v386_v0 = vmul.f32 %v382_v61, %v382_v61  ;;  %v381_v1 = vmax.f32 %v371_v62, 0.0  ;;  %v387_v2 = vmul.f32 %v383_v63, %v379_v57  ;;  %v778_v57 = vld [vmem:[#allocation6 + $0x68] sm:$0xff]  ;;  %v773_v62 = vld [vmem:[#allocation6 + $0x40] sm:$0xff]  ;;  %v772_v63 = vld [vmem:[#allocation6 + $0x38] sm:$0xff] }
 0x11f   : > { %v385_v4 = vmul.f32 %v381_v1, %v381_v1  ;;  %1188 = vmatprep.mubr.f32.mxu1 %v387_v2  ;;  %v390_v5 = vmul.f32 %v386_v0, %v382_v61  ;;  %v774_v61 = vld [vmem:[#allocation6 + $0x48] sm:$0xff]  ;;  %v1011_v0 = vld [vmem:[%s1743_s2 + $0x2] ss:$0 sm:$0xff] }
 0x120   : > { %1189 = vmatmul.mubr.f32.vlgmr.msra.gmra.mxu1 %v388_v3 }
 0x121   : > { %v389_v6 = vmul.f32 %v385_v4, %v381_v1  ;;  %1233 = vmatpush3.msra.mxu1 %v655_v14 }
 0x122   : > { %1234 = vmatprep.subr.mxu1 %v654_v15 }
 0x123   : > { %1191 = vmatprep.mubr.f32.mxu1 %v389_v6  ;;  %1235 = vmatpush3.msra.mxu1 %v654_v15 }
 0x124   : > { %1192 = vmatmul.mubr.f32.gmra.mxu1 %v390_v5  ;;  %1236 = vmatprep.subr.mxu1 %v653_v16 }
 0x125   : > { %1237 = vmatpush3.msra.mxu1 %v653_v16 }
 0x126   : > { %1238 = vmatprep.subr.mxu1 %v652_v18 }
 0x127   : > { %1239 = vmatpush3.msra.mxu1 %v652_v18 }
 0x128   : > { %1240 = vmatprep.subr.mxu1 %v651_v19 }
 0x129   : > { %1241 = vmatpush3.msra.mxu1 %v651_v19 }
 0x12a   : > { %1242 = vmatprep.subr.mxu1 %v650_v20 }
 0x12b   : > { %1243 = vmatpush3.msra.mxu1 %v650_v20 }
 0x12c   : > { %1244 = vmatprep.subr.mxu1 %v649_v21 }
 0x12d   : > { %1245 = vmatpush3.msra.mxu1 %v649_v21 }
 0x12e   : > { %1246 = vmatprep.subr.mxu1 %v648_v22 }
 0x12f   : > { %1247 = vmatpush3.msra.mxu1 %v648_v22  ;;  %v771_v22 = vld [vmem:[#allocation6 + $0x30] sm:$0xff] }
 0x130   : > { %1248 = vmatprep.subr.mxu1 %v647_v23 }
 0x131   : > { %1249 = vmatpush3.msra.mxu1 %v647_v23  ;;  %v770_v23 = vld [vmem:[#allocation6 + $0x28] sm:$0xff] }
 0x132   : > { %1250 = vmatprep.subr.mxu1 %v646_v24 }
 0x133   : > { %1251 = vmatpush3.msra.mxu1 %v646_v24  ;;  %v769_v24 = vld [vmem:[#allocation6 + $0x20] sm:$0xff] }
 0x1e0   : > { %v1190_v26 = vpop.f32.mrf.mxu1 }
 0x1e1   : > { %v488_v27 = vadd.f32 %v1190_v26, %v1009_v25  ;;  %v767_v26 = vld [vmem:[#allocation6 + $0x10] sm:$0xff] }
 0x1e2   : > { %v482_v28 = vpop.f32.mrf.mxu1 }
 0x1e3   : > { %v502_v29 = vmax.f32 %v488_v27, 0.0  ;;  %v483_v30 = vadd.f32 %v1009_v25, %v482_v28  ;;  %v766_v27 = vld [vmem:[#allocation6 + $0x8] sm:$0xff]  ;;  %v765_v28 = vld [vmem:[#allocation6] sm:$0xff] }
 0x1e4   : > { %v1193_v31 = vpop.f32.mrf.mxu1 }
 0x1e5   : > { %v506_v35 = vmul.f32 %v502_v29, %v502_v29  ;;  %v501_v36 = vmax.f32 %v483_v30, 0.0  ;;  %v498_v37 = vadd.f32 %v1193_v31, %v1009_v25 }
 0x1e6   : > { %v492_v38 = vpop.f32.mrf.mxu1 }
 0x1e7   : > { %v505_v39 = vmul.f32 %v501_v36, %v501_v36  ;;  %v504_v40 = vmax.f32 %v498_v37, 0.0  ;;  %v493_v41 = vadd.f32 %v1009_v25, %v492_v38  ;;  %v510_v42 = vmul.f32 %v506_v35, %v502_v29  ;;  %v768_v25 = vld [vmem:[#allocation6 + $0x18] sm:$0xff]  ;;  %v1013_v29 = vld [vmem:[%s1743_s2 + $0x3] ss:$0 sm:$0xff] }
 0x1e9   : > { %v509_v43 = vmul.f32 %v505_v39, %v501_v36  ;;  %v508_v44 = vmul.f32 %v504_v40, %v504_v40  ;;  %v503_v45 = vmax.f32 %v493_v41, 0.0  ;;  %v1676_v48 = vadd.f32 %v510_v42, %v1657_v32  ;;  %v644_v32 = vld [vmem:[#allocation3 + $0x1a0] sm:$0xff] }
 0x1eb   : > { %v507_v46 = vmul.f32 %v503_v45, %v503_v45  ;;  %v1673_v47 = vadd.f32 %v509_v43, %v1654_v17  ;;  %v512_v49 = vmul.f32 %v508_v44, %v504_v40  ;;  %v645_v17 = vld [vmem:[#allocation3 + $0x1a8] sm:$0xff] }
 0x1ec   : > { %1252 = vmatprep.subr.mxu1 %v645_v17 }
 0x1ed   : > { %v511_v50 = vmul.f32 %v507_v46, %v503_v45  ;;  %1226 = vmatprep.mubr.f32.mxu0 %v1673_v47  ;;  %v1684_v52 = vadd.f32 %v512_v49, %v1663_v34  ;;  %1253 = vmatpush3.msra.mxu1 %v645_v17  ;;  %v640_v34 = vld [vmem:[#allocation3 + $0x180] sm:$0xff] }
 0x1ee   : > { %1227 = vmatmul.mubr.f32.vlgmr.msra.gmra.mxu0 %v1676_v48  ;;  %1254 = vmatprep.subr.mxu1 %v644_v32 }
 0x1ef   : > { %v1681_v51 = vadd.f32 %v511_v50, %v1659_v33  ;;  %1255 = vmatpush3.msra.mxu1 %v644_v32  ;;  %v641_v33 = vld [vmem:[#allocation3 + $0x188] sm:$0xff]  ;;  %1271 = vmatpush3.msra.mxu0 %v780_v55 }
 0x1f0   : > { %1256 = vmatprep.subr.mxu1 %v643_v53  ;;  %1272 = vmatprep.subr.mxu0 %v779_v56 }
 0x1f1   : > { %1229 = vmatprep.mubr.f32.mxu0 %v1681_v51  ;;  %1257 = vmatpush3.msra.mxu1 %v643_v53 }
 0x1f2   : > { %1230 = vmatmul.mubr.f32.gmra.mxu0 %v1684_v52  ;;  %1258 = vmatprep.subr.mxu1 %v642_v54 }
 0x1f3   : > { %1259 = vmatpush3.msra.mxu1 %v642_v54  ;;  %1273 = vmatpush3.msra.mxu0 %v779_v56 }
 0x1f4   : > { %1260 = vmatprep.subr.mxu1 %v641_v33  ;;  %1274 = vmatprep.subr.mxu0 %v778_v57 }
 0x1f5   : > { %1261 = vmatpush3.msra.mxu1 %v641_v33  ;;  %1275 = vmatpush3.msra.mxu0 %v778_v57 }
 0x1f6   : > { %1262 = vmatprep.subr.mxu1 %v640_v34  ;;  %1276 = vmatprep.subr.mxu0 %v777_v58 }
 0x1f7   : > { %1263 = vmatpush3.msra.mxu1 %v640_v34  ;;  %1277 = vmatpush3.msra.mxu0 %v777_v58 }
 0x1f8   : > { %1308 = vmatprep.subr.mxu1 %v780_v55  ;;  %1278 = vmatprep.subr.mxu0 %v776_v59 }
 0x1f9   : > { %1279 = vmatpush3.msra.mxu0 %v776_v59 }
 0x1fa   : > { %1280 = vmatprep.subr.mxu0 %v775_v60 }
 0x1fb   : > { %1281 = vmatpush3.msra.mxu0 %v775_v60 }
 0x1fc   : > { %1282 = vmatprep.subr.mxu0 %v774_v61 }
 0x1fd   : > { %1283 = vmatpush3.msra.mxu0 %v774_v61 }
 0x1fe   : > { %1284 = vmatprep.subr.mxu0 %v773_v62 }
 0x1ff   : > { %1285 = vmatpush3.msra.mxu0 %v773_v62 }
 0x200   : > { %1286 = vmatprep.subr.mxu0 %v772_v63 }
 0x201   : > { %1287 = vmatpush3.msra.mxu0 %v772_v63 }
 0x202   : > { %1288 = vmatprep.subr.mxu0 %v771_v22 }
 0x203   : > { %1289 = vmatpush3.msra.mxu0 %v771_v22 }
 0x204   : > { %1290 = vmatprep.subr.mxu0 %v770_v23 }
 0x205   : > { %1291 = vmatpush3.msra.mxu0 %v770_v23 }
 0x206   : > { %1292 = vmatprep.subr.mxu0 %v769_v24 }
 0x207   : > { %1293 = vmatpush3.msra.mxu0 %v769_v24 }
 0x208   : > { %1294 = vmatprep.subr.mxu0 %v768_v25 }
 0x209   : > { %1295 = vmatpush3.msra.mxu0 %v768_v25 }
 0x20a   : > { %1296 = vmatprep.subr.mxu0 %v767_v26 }
 0x20b   : > { %1297 = vmatpush3.msra.mxu0 %v767_v26 }
 0x20c   : > { %1298 = vmatprep.subr.mxu0 %v766_v27 }
 0x20d   : > { %1299 = vmatpush3.msra.mxu0 %v766_v27 }
 0x20e   : > { %1300 = vmatprep.subr.mxu0 %v765_v28 }
 0x20f   : > { %1301 = vmatpush3.msra.mxu0 %v765_v28 }
 0x2ae   : > { %v1228_v1 = vpop.f32.mrf.mxu0 }
 0x2af   : > { %v614_v2 = vadd.f32 %v1228_v1, %v1011_v0 }
 0x2b0   : > { %v608_v3 = vpop.f32.mrf.mxu0 }
 0x2b1   : > { %v628_v4 = vmax.f32 %v614_v2, 0.0  ;;  %v609_v5 = vadd.f32 %v1011_v0, %v608_v3 }
 0x2b2   : > { %v1231_v6 = vpop.f32.mrf.mxu0 }
 0x2b3   : > { %v627_v7 = vmax.f32 %v609_v5, 0.0  ;;  %v624_v8 = vadd.f32 %v1231_v6, %v1011_v0  ;;  %v632_v9 = vmul.f32 %v628_v4, %v628_v4 }
 0x2b4   : > { %v618_v10 = vpop.f32.mrf.mxu0 }
 0x2b5   : > { %v631_v11 = vmul.f32 %v627_v7, %v627_v7  ;;  %v630_v12 = vmax.f32 %v624_v8, 0.0  ;;  %v619_v13 = vadd.f32 %v1011_v0, %v618_v10  ;;  %v636_v16 = vmul.f32 %v632_v9, %v628_v4 }
 0x2b7   : > { %v635_v14 = vmul.f32 %v631_v11, %v627_v7  ;;  %v629_v15 = vmax.f32 %v619_v13, 0.0  ;;  %v634_v18 = vmul.f32 %v630_v12, %v630_v12 }
 0x2b9   : > { %v633_v19 = vmul.f32 %v629_v15, %v629_v15  ;;  %1264 = vmatprep.mubr.f32.mxu1 %v635_v14  ;;  %v638_v21 = vmul.f32 %v634_v18, %v630_v12 }
 0x2ba   : > { %1265 = vmatmul.mubr.f32.vlgmr.msra.gmra.mxu1 %v636_v16 }
 0x2bb   : > { %v637_v20 = vmul.f32 %v633_v19, %v629_v15  ;;  %1324 = vmatpush3.msra.mxu1 %v780_v55 }
 0x2bc   : > { %1309 = vmatprep.subr.mxu1 %v779_v56 }
 0x2bd   : > { %1267 = vmatprep.mubr.f32.mxu1 %v637_v20  ;;  %1325 = vmatpush3.msra.mxu1 %v779_v56 }
 0x2be   : > { %1268 = vmatmul.mubr.f32.gmra.mxu1 %v638_v21  ;;  %1310 = vmatprep.subr.mxu1 %v778_v57 }
 0x2bf   : > { %1326 = vmatpush3.msra.mxu1 %v778_v57 }
 0x2c0   : > { %1311 = vmatprep.subr.mxu1 %v777_v58 }
 0x2c1   : > { %1327 = vmatpush3.msra.mxu1 %v777_v58  ;;  %v1014_v58 = vld [vmem:[%s1745_s4] ss:$0 sm:$0xff] }
 0x2c2   : > { %1312 = vmatprep.subr.mxu1 %v776_v59 }
 0x2c3   : > { %1328 = vmatpush3.msra.mxu1 %v776_v59 }
 0x2c4   : > { %1313 = vmatprep.subr.mxu1 %v775_v60 }
 0x2c5   : > { %1329 = vmatpush3.msra.mxu1 %v775_v60 }
 0x2c6   : > { %1314 = vmatprep.subr.mxu1 %v774_v61 }
 0x2c7   : > { %1330 = vmatpush3.msra.mxu1 %v774_v61 }
 0x2c8   : > { %1315 = vmatprep.subr.mxu1 %v773_v62 }
 0x2c9   : > { %1331 = vmatpush3.msra.mxu1 %v773_v62 }
 0x2ca   : > { %1316 = vmatprep.subr.mxu1 %v772_v63 }
 0x2cb   : > { %1332 = vmatpush3.msra.mxu1 %v772_v63 }
 0x2cc   : > { %1317 = vmatprep.subr.mxu1 %v771_v22 }
 0x2cd   : > { %1333 = vmatpush3.msra.mxu1 %v771_v22 }
 0x2ce   : > { %1318 = vmatprep.subr.mxu1 %v770_v23 }
 0x2cf   : > { %1334 = vmatpush3.msra.mxu1 %v770_v23 }
 0x2d0   : > { %1319 = vmatprep.subr.mxu1 %v769_v24 }
 0x2d1   : > { %1335 = vmatpush3.msra.mxu1 %v769_v24 }
 0x2d2   : > { %1320 = vmatprep.subr.mxu1 %v768_v25 }
 0x2d3   : > { %1336 = vmatpush3.msra.mxu1 %v768_v25 }
 0x2d4   : > { %1321 = vmatprep.subr.mxu1 %v767_v26 }
 0x2d5   : > { %1337 = vmatpush3.msra.mxu1 %v767_v26 }
 0x2d6   : > { %1322 = vmatprep.subr.mxu1 %v766_v27 }
 0x2d7   : > { %1338 = vmatpush3.msra.mxu1 %v766_v27 }
 0x2d8   : > { %1323 = vmatprep.subr.mxu1 %v765_v28 }
 0x2d9   : > { %1339 = vmatpush3.msra.mxu1 %v765_v28 }
 0x37a   : > { %v1266_v30 = vpop.f32.mrf.mxu1 }
 0x37b   : > { %v736_v31 = vadd.f32 %v1266_v30, %v1013_v29 }
 0x37c   : > { %v730_v35 = vpop.f32.mrf.mxu1 }
 0x37d   : > { %v750_v36 = vmax.f32 %v736_v31, 0.0  ;;  %v731_v37 = vadd.f32 %v1013_v29, %v730_v35 }
 0x37e   : > { %v1269_v38 = vpop.f32.mrf.mxu1 }
 0x37f   : > { %v754_v39 = vmul.f32 %v750_v36, %v750_v36  ;;  %v749_v40 = vmax.f32 %v731_v37, 0.0  ;;  %v746_v41 = vadd.f32 %v1269_v38, %v1013_v29 }
 0x380   : > { %v740_v42 = vpop.f32.mrf.mxu1 }
 0x381   : > { %v753_v43 = vmul.f32 %v749_v40, %v749_v40  ;;  %v752_v44 = vmax.f32 %v746_v41, 0.0  ;;  %v741_v45 = vadd.f32 %v1013_v29, %v740_v42  ;;  %v758_v46 = vmul.f32 %v754_v39, %v750_v36 }
 0x383   : > { %v757_v49 = vmul.f32 %v753_v43, %v749_v40  ;;  %v756_v50 = vmul.f32 %v752_v44, %v752_v44  ;;  %v751_v17 = vmax.f32 %v741_v45, 0.0  ;;  %v762_v54 = vadd.f32 %v758_v46, %v1676_v48 }
 0x385   : > { %v755_v32 = vmul.f32 %v751_v17, %v751_v17  ;;  %v761_v53 = vadd.f32 %v757_v49, %v1673_v47  ;;  %v760_v33 = vmul.f32 %v756_v50, %v752_v44 }
 0x387   : > { %v759_v34 = vmul.f32 %v755_v32, %v751_v17  ;;  %1302 = vmatprep.mubr.f32.mxu0 %v761_v53  ;;  %v764_v56 = vadd.f32 %v760_v33, %v1684_v52 }
 0x388   : > { %1303 = vmatmul.mubr.f32.vlgmr.msra.gmra.mxu0 %v762_v54 }
 0x389   : > { %v763_v55 = vadd.f32 %v759_v34, %v1681_v51 }
 0x38b   : > { %1305 = vmatprep.mubr.f32.mxu1 %v763_v55 }
 0x38c   : > { %1306 = vmatmul.mubr.f32.vlgmr.msra.gmra.mxu1 %v764_v56 }
 0x448   : > { %v1304_v57 = vpop.f32.mrf.mxu0 }
 0x449   : > { %v860_v60 = vadd.f32 %v1304_v57, %v1014_v58 }
 0x44a   : > { %v854_v47 = vpop.f32.mrf.mxu0 }
 0x44b   : > { %v855_v59 = vadd.f32 %v1014_v58, %v854_v47 }
 0x44c   : > { %v1307_v48 = vpop.f32.mrf.mxu1 }
 0x44d   : > { %873 = vxpose.xlu0.b32.start [1/4] (short) (narrow) %v855_v59, 8  ;;  %v870_v51 = vadd.f32 %v1307_v48, %v1014_v58 }
 0x44e   : > { %v864_v61 = vpop.f32.mrf.mxu1 }
 0x44f   : > { %v865_v62 = vadd.f32 %v1014_v58, %v864_v61 }
 0x451   : > { %874 = vxpose.xlu0.b32.cont [2/4] (short) (narrow) %v860_v60, 8 }
 0x455   : > { %875 = vxpose.xlu0.b32.cont [3/4] (short) (narrow) %v865_v62, 8 }
 0x459   : > { %876 = vxpose.xlu0.b32.end [4/4] (short) (narrow) %v870_v51, 8 }
 0x4c9   : > { %v889_v52 = vpop.trf.xlu0 }
 0x4ca   : > { %906 = vst.msk [vmem:[%s247_s26] sm:$0x1] %vm905_vm1, %v889_v52 }
 0x4cb   : > { %1468 = shalt.err (!%p1465_p3)
}
 0x4cc   : > { %s1469_s13 = scalar_lea.hbm %s1706_s8, 16  ;;  %s1473_s16 = scalar_lea.hbm %s1746_s5, 32 }
 0x4cd   : > { %p1470_p2 = scmp.ne.s32.totalorder %s1706_s8, %s1469_s13  ;;  %p1474_p7 = scmp.lt.s32.totalorder %s1706_s8, %s1746_s5 }
 0x4ce   : > { %p1475_p6 = scmp.lt.s32.totalorder %s1473_s16, %s1469_s13 }
 0x4cf   : > { %p1471_p4 = pnand %p1470_p2, %p1599_p5 }
 0x4d0   : > { %p1476_p9 = por %p1475_p6, %p1474_p7 }
 0x4d1   : > { %p1472_p13 = pneg %p1471_p4 }
 0x4d3   : > { %p1477_p10 = pnand %p1476_p9, %p1472_p13 }
 0x4d5   : > { %1480 = shalt.err (!%p1477_p10)
}
 0x4d6   : > { %1348 = dma.vmem_to_hbm [thread:$0]  (%p1599_p5), %s921_s30, 16, %s1706_s8, %s908_s9  }
 0x4d7 PF: > { %p1365_p12 = scmp.ge.s32.totalorder %s1523_s21, 2  ;;  %s932_s25 = sand.u32 1, %s1511_s18  }
 0x4d8   : > { %p1756_p8 = scmp.ne.s32.totalorder %s1749_s29, 0  ;;  %s933_s26 = scalar_lea.sflag [#allocation5], %s932_s25 }
 0x4da   : > { %p1358_p11 = pnand %p1365_p12, %p1756_p8 }
 0x4dc   : > { %p1359_p0 = pneg %p1358_p11 }
 0x4de   : > { %1506 = dma.done.wait (%p1359_p0), %s933_s26, 16  }
 0x4df   : > { %1508 = vsyncadd (%p1359_p0), %s933_s26, 4294967280  ;;  %p17_p1 = scmp.ge.s32.totalorder %s1586_s24, 4   ;;  %s1757_s18 = smov %s1515_s19 }
 0x4e0   : > { %s1758_s19 = smov %s1519_s20  ;;  %s1759_s20 = smov %s1597_s27 }
 0x4e1   : > { %s1760_s21 = smov %s1586_s24  ;;  %19 = sbr.rel (!%p17_p1) target bundleno = 5 (0x5), region = 90 }
 0x4e6   :  { %937 = vsyncpa [#allocation4], 1 }
 0x4e7   :  { %939 = vsyncpa [#allocation4 + $0x1], 1 }
 0x4e8   :  { %940 = vsyncpa [#allocation7], 1 }
 0x4e9   :  { %941 = vsyncpa [#allocation5], 1 }
 0x4ea   :  { %943 = vsyncpa [#allocation5 + $0x1], 1 }

// kernel: tpu_custom_call.1
= control target key start
LH: loop header
LB: loop body
LE: loop exit
PB: predicated region body
PF: predicated region fallthrough
CT: control target
= control target key end

     0   :  { %10 = vsyncpa [#allocation4], 0  ;;  %s1741_s0 = inlined_call_operand.vmem [shape: f32[64,2], index: 0, kind: input, shape index: {}]   ;;  %s1742_s1 = inlined_call_operand.hbm [shape: f32[4,128,128], index: 1, kind: input, shape index: {}]   ;;  %s1743_s2 = inlined_call_operand.vmem [shape: f32[4,1,128], index: 2, kind: input, shape index: {}]   ;;  %s1744_s3 = inlined_call_operand.hbm [shape: f32[128,128], index: 3, kind: input, shape index: {}]   ;;  %s1745_s4 = inlined_call_operand.vmem [shape: f32[1,128], index: 4, kind: input, shape index: {}]   ;;  %s1746_s5 = inlined_call_operand.hbm [shape: f32[2,1,32], index: 5, kind: output, shape index: {}]  }
   0x1   :  { %11 = vsyncpa [#allocation7], 0 }
   0x2   :  { %12 = vsyncpa [#allocation5], 0 }
   0x3   :  { %14 = vsyncpa [#allocation5 + $0x1], 0  ;;  %s1561_s18 = smov 0   ;;  %s1563_s19 = smov 0  }
   0x4   :  { %s1565_s20 = smov 0   ;;  %s1567_s21 = smov 0  }
   0x5 LB: > { %s1582_s22 = sadd.s32 4294967295, %s1523_s21   ;;  %s997_s23 = sadd.s32 4294967294, %s1523_s21   ;;  %s1523_s21 = sphi %s1567_s21, %s1760_s21   ;;  %s1519_s20 = sphi %s1565_s20, %s1759_s20   ;;  %s1515_s19 = sphi %s1563_s19, %s1758_s19   ;;  %s1511_s18 = sphi %s1561_s18, %s1757_s18  }
   0x6   : > { %s1586_s24 = sadd.s32 1, %s1523_s21   ;;  %s137_s25 = sadd.s32 1, %s1519_s20 }
   0x7   : > { %s134_s26 = ssub.s32 %s1523_s21, %s1586_s24  ;;  %p147_p0 = scmp.ne.s32.totalorder %s1519_s20, %s1515_s19 }
   0x8   : > { %p135_p1 = scmp.eq.s32.totalorder %s134_s26, 0  ;;  %p148_p2 = scmp.eq.s32.totalorder %s1582_s22, 1 }
   0x9   : > { %p153_p3 = scmp.ne.s32.totalorder %s1515_s19, %s1511_s18  ;;  %p154_p4 = scmp.eq.s32.totalorder %s997_s23, 1 }
   0xa   : > { %s1597_s27 = scalar_select %p135_p1, %s1519_s20, %s137_s25  }
   0xb   : > { %p1599_p5 = por %p148_p2, %p147_p0  ;;  %p1603_p6 = por %p154_p4, %p153_p3 }
   0xc   : > { %p998_p7 = scmp.ge.s32.totalorder %s1523_s21, 1  ;;  %p161_p8 = scmp.lt.s32.totalorder %s1523_s21, 3 }
   0xd   : > { %s1749_s29 = scalar_select %p1603_p6, 1, 0 }
   0xe   : > { %p1747_p9 = scmp.eq.s32.totalorder %s1582_s22, 0  ;;  %p1610_p10 = pnand %p998_p7, %p161_p8 }
   0xf   : > { %s1525_s6 = smov [#allocation3]   ;;  %s1526_s9 = smov [#allocation6]  }
  0x10   : > { %s173_s7 = sshll.u32 %s1525_s6, 4  ;;  %p1350_p11 = pneg %p1610_p10  ;;  %s174_s7 = int_to_ptr.vmem [resolvable:$true] %s173_s7 }
  0x11   : > { %s189_s10 = sshll.u32 %s1526_s9, 4  ;;  %s1414_s11 = scalar_lea.vmem %s174_s7, 8192  ;;  %s190_s10 = int_to_ptr.vmem [resolvable:$true] %s189_s10 }
  0x12   : > { %p1618_p12 = pnand %p1747_p9, %p1350_p11  ;;  %p1415_p0 = scmp.ne.s32.totalorder %s174_s7, %s1414_s11 }
  0x13   : > { %p1422_p3 = scmp.lt.s32.totalorder %s174_s7, %s174_s7  ;;  %p1423_p4 = scmp.lt.s32.totalorder %s1414_s11, %s1414_s11 }
  0x14   : > { %p1405_p13 = pneg %p1618_p12 }
  0x15   : > { %p1424_p7 = por %p1423_p4, %p1422_p3 }
  0x16   : > { %p1417_p1 = pnand %p1415_p0, %p1405_p13 }
  0x18   : > { %p1418_p2 = pneg %p1417_p1 }
  0x1a   : > { %p1425_p8 = pnand %p1424_p7, %p1418_p2 }
  0x1c   : > { %1428 = shalt.err (!%p1425_p8)
}
  0x1d   : > { %s1527_s12 = smov 128   ;;  %s1528_s13 = smov 8  }
  0x1e   : > { %1353 = dma.hbm_to_vmem [thread:$0]  (!%p1618_p12), %s1742_s1, 8192, %s174_s7, [#allocation4], %s1527_s12, %s1527_s12, %s1528_s13  }
  0x1f   : > { %s1440_s16 = scalar_lea.vmem %s190_s10, 2048  ;;  %p1448_p9 = scmp.lt.s32.totalorder %s190_s10, %s190_s10 }
  0x20   : > { %p1441_p11 = scmp.ne.s32.totalorder %s190_s10, %s1440_s16  ;;  %p1449_p6 = scmp.lt.s32.totalorder %s1440_s16, %s1440_s16 }
  0x22   : > { %p1443_p0 = pnand %p1441_p11, %p1405_p13  ;;  %p1450_p3 = por %p1449_p6, %p1448_p9 }
  0x24   : > { %p1444_p1 = pneg %p1443_p0 }
  0x26   : > { %p1451_p2 = pnand %p1450_p3, %p1444_p1 }
  0x28   : > { %1454 = shalt.err (!%p1451_p2)
}
  0x29   : > { %1356 = dma.hbm_to_vmem [thread:$0]  (!%p1618_p12), %s1744_s3, 2048, %s190_s10, [#allocation7], %s1527_s12, %s1527_s12, %s1528_s13  }
  0x2a   : > { %217 = sbr.rel (%p1610_p10) target bundleno = 1239 (0x4d7), region = 40  ;;  %p1752_p4 = scmp.eq.s32.totalorder (!%p1610_p10), %s1582_s22, 0 }
  0x2f   : > { %1498 = dma.done.wait (%p1752_p4), [#allocation4], 8192   ;;  %p1753_p13 = pmov %p1752_p4 }
  0x30   : > { %p1754_p7 = pmov %p1752_p4 }
  0x31   : > { %1500 = vsyncadd (%p1753_p13), [#allocation4], 4294959104 }
  0x32   : > { %1502 = dma.done.wait (%p1754_p7), [#allocation7], 2048   ;;  %p1755_p6 = pmov %p1752_p4 }
  0x33   : > { %s1005_s25 = sshll.u32 %s1582_s22, 2  ;;  %v1529_v0 = vmov 0.0   ;;  %v286_v1 = vld [vmem:[#allocation3 + $0x78] sm:$0xff]  ;;  %v285_v2 = vld [vmem:[#allocation3 + $0x70] sm:$0xff]  ;;  %v284_v3 = vld [vmem:[#allocation3 + $0x68] sm:$0xff]  ;;  %vm262_vm0 = vcmask 15360  }
  0x34   : > { %1504 = vsyncadd (%p1755_p6), [#allocation7], 4294965248  ;;  %p249_p9 = scmp.lt.s32.totalorder %s1005_s25, 7  ;;  %254 = vst [vmem:[#allocation2] sm:$0xff] %v1529_v0  ;;  %1118 = vmatprep.subr.mxu0 %v286_v1  ;;  %v283_v4 = vld [vmem:[#allocation3 + $0x60] sm:$0xff]  ;;  %v282_v5 = vld [vmem:[#allocation3 + $0x58] sm:$0xff] }
  0x35   : > { %255 = vst [vmem:[#allocation2 + $0x8] sm:$0xff] %v1529_v0  ;;  %256 = vst [vmem:[#allocation2 + $0x10] sm:$0xff] %v1529_v0  ;;  %1119 = vmatpush3.msra.mxu0 %v286_v1  ;;  %v407_v10 = vld [vmem:[#allocation3 + $0xf8] sm:$0xff]  ;;  %v406_v11 = vld [vmem:[#allocation3 + $0xf0] sm:$0xff]  ;;  %s246_s23 = sand.u32 1, %s1515_s19   ;;  %vm905_vm1 = vcmask 253952  }
  0x36   : > { %257 = vst [vmem:[#allocation2 + $0x18] sm:$0xff] %v1529_v0  ;;  %s1762_s25 = smov (!%p249_p9, %s1005_s25), 7  ;;  %1120 = vmatprep.subr.mxu0 %v285_v2  ;;  %1156 = vmatprep.subr.mxu1 %v407_v10  ;;  %v281_v12 = vld [vmem:[#allocation3 + $0x50] sm:$0xff]  ;;  %v405_v13 = vld [vmem:[#allocation3 + $0xe8] sm:$0xff]  ;;  %v404_v15 = vld [vmem:[#allocation3 + $0xe0] sm:$0xff]  ;;  %s908_s9 = scalar_lea.sflag [#allocation5], %s246_s23 }
  0x37   : > { %s1006_s26 = sshll.u32 %s1762_s25, 3  ;;  %1121 = vmatpush3.msra.mxu0 %v285_v2  ;;  %1157 = vmatpush3.msra.mxu1 %v407_v10  ;;  %v280_v14 = vld [vmem:[#allocation3 + $0x48] sm:$0xff]  ;;  %v279_v16 = vld [vmem:[#allocation3 + $0x40] sm:$0xff]  ;;  %v403_v18 = vld [vmem:[#allocation3 + $0xd8] sm:$0xff]  ;;  %s1015_s25 = sshll.u32 %s1582_s22, 4 }
  0x38   : > { %s252_s7 = scalar_lea.vmem %s1741_s0, %s1006_s26  ;;  %1122 = vmatprep.subr.mxu0 %v284_v3  ;;  %1158 = vmatprep.subr.mxu1 %v406_v11  ;;  %v278_v19 = vld [vmem:[#allocation3 + $0x38] sm:$0xff]  ;;  %v402_v20 = vld [vmem:[#allocation3 + $0xd0] sm:$0xff]  ;;  %v401_v22 = vld [vmem:[#allocation3 + $0xc8] sm:$0xff]  ;;  %s247_s26 = scalar_lea.vmem [#allocation8], %s246_s23 }
  0x39   : > { %v258_v6 = vld [vmem:[%s252_s7] sm:$0xff]  ;;  %v259_v7 = vld [vmem:[%s252_s7 + $0x8] sm:$0xff]  ;;  %1123 = vmatpush3.msra.mxu0 %v284_v3  ;;  %v260_v8 = vld [vmem:[%s252_s7 + $0x10] sm:$0xff]  ;;  %1159 = vmatpush3.msra.mxu1 %v406_v11  ;;  %s920_s30 = sshll.u32 %s247_s26, 4  ;;  %s1706_s8 = scalar_lea.hbm %s1746_s5, %s1015_s25  ;;  %s921_s30 = int_to_ptr.vmem [resolvable:$true] %s920_s30 }
  0x3a   : > { %263 = vst.msk [vmem:[#allocation2] sm:$0xff] %vm262_vm0, %v258_v6  ;;  %264 = vst.msk [vmem:[#allocation2 + $0x8] sm:$0xff] %vm262_vm0, %v259_v7  ;;  %v261_v9 = vld [vmem:[%s252_s7 + $0x18] sm:$0xff]  ;;  %1124 = vmatprep.subr.mxu0 %v283_v4  ;;  %1160 = vmatprep.subr.mxu1 %v405_v13  ;;  %v277_v21 = vld [vmem:[#allocation3 + $0x30] sm:$0xff]  ;;  %s1455_s10 = scalar_lea.vmem %s921_s30, 16  ;;  %s1530_s11 = smov [#allocation8]  }
  0x3b   : > { %265 = vst.msk [vmem:[#allocation2 + $0x10] sm:$0xff] %vm262_vm0, %v260_v8  ;;  %266 = vst.msk [vmem:[#allocation2 + $0x18] sm:$0xff] %vm262_vm0, %v261_v9  ;;  %1125 = vmatpush3.msra.mxu0 %v283_v4  ;;  %1161 = vmatpush3.msra.mxu1 %v405_v13  ;;  %v276_v23 = vld [vmem:[#allocation3 + $0x28] sm:$0xff]  ;;  %v400_v24 = vld [vmem:[#allocation3 + $0xc0] sm:$0xff]  ;;  %p1456_p10 = scmp.ne.s32.totalorder %s921_s30, %s1455_s10  ;;  %s1459_s12 = sshll.u32 %s1530_s11, 4  ;;  %s1460_s12 = int_to_ptr.vmem [resolvable:$false] %s1459_s12 }
  0x3c   : > { %1126 = vmatprep.subr.mxu0 %v282_v5  ;;  %1162 = vmatprep.subr.mxu1 %v404_v15  ;;  %v275_v25 = vld [vmem:[#allocation3 + $0x20] sm:$0xff]  ;;  %v399_v26 = vld [vmem:[#allocation3 + $0xb8] sm:$0xff]  ;;  %v398_v28 = vld [vmem:[#allocation3 + $0xb0] sm:$0xff]  ;;  %s1461_s22 = scalar_lea.vmem %s1460_s12, 32  ;;  %p1462_p11 = scmp.lt.s32.totalorder %s921_s30, %s1460_s12 }
  0x3d   : > { %1127 = vmatpush3.msra.mxu0 %v282_v5  ;;  %1163 = vmatpush3.msra.mxu1 %v404_v15  ;;  %v274_v27 = vld [vmem:[#allocation3 + $0x18] sm:$0xff]  ;;  %v273_v29 = vld [vmem:[#allocation3 + $0x10] sm:$0xff]  ;;  %v272_v30 = vld [vmem:[#allocation3 + $0x8] sm:$0xff]  ;;  %p1457_p12 = pnand %p1456_p10, %p1599_p5  ;;  %p1463_p0 = scmp.lt.s32.totalorder %s1461_s22, %s1455_s10 }
  0x3e   : > { %1128 = vmatprep.subr.mxu0 %v281_v12  ;;  %1164 = vmatprep.subr.mxu1 %v403_v18  ;;  %v271_v31 = vld [vmem:[#allocation3] sm:$0xff]  ;;  %v397_v35 = vld [vmem:[#allocation3 + $0xa8] sm:$0xff]  ;;  %v395_v37 = vld [vmem:[#allocation3 + $0x98] sm:$0xff] }
  0x3f   : > { %1129 = vmatpush3.msra.mxu0 %v281_v12  ;;  %1165 = vmatpush3.msra.mxu1 %v403_v18  ;;  %v396_v36 = vld [vmem:[#allocation3 + $0xa0] sm:$0xff]  ;;  %v394_v38 = vld [vmem:[#allocation3 + $0x90] sm:$0xff]  ;;  %v393_v39 = vld [vmem:[#allocation3 + $0x88] sm:$0xff]  ;;  %p1458_p8 = pneg %p1457_p12  ;;  %p1464_p1 = por %p1463_p0, %p1462_p11 }
  0x40   : > { %1130 = vmatprep.subr.mxu0 %v280_v14  ;;  %1166 = vmatprep.subr.mxu1 %v402_v20  ;;  %v392_v40 = vld [vmem:[#allocation3 + $0x80] sm:$0xff]  ;;  %v533_v41 = vld [vmem:[#allocation3 + $0x178] sm:$0xff]  ;;  %v532_v42 = vld [vmem:[#allocation3 + $0x170] sm:$0xff] }
  0x41   : > { %v1654_v17 = vld [vmem:[#allocation2] sm:$0xff]  ;;  %1131 = vmatpush3.msra.mxu0 %v280_v14  ;;  %1167 = vmatpush3.msra.mxu1 %v402_v20  ;;  %v1657_v32 = vld [vmem:[#allocation2 + $0x8] sm:$0xff]  ;;  %v529_v45 = vld [vmem:[#allocation3 + $0x158] sm:$0xff]  ;;  %p1465_p3 = pnand %p1464_p1, %p1458_p8 }
  0x42   : > { %1150 = vmatprep.mubr.f32.mxu0 %v1654_v17  ;;  %1132 = vmatprep.subr.mxu0 %v279_v16  ;;  %v1659_v33 = vld [vmem:[#allocation2 + $0x10] sm:$0xff]  ;;  %v1663_v34 = vld [vmem:[#allocation2 + $0x18] sm:$0xff]  ;;  %v531_v43 = vld [vmem:[#allocation3 + $0x168] sm:$0xff] }
  0x43   : > { %1133 = vmatpush3.msra.mxu0 %v279_v16  ;;  %1168 = vmatprep.subr.mxu1 %v401_v22  ;;  %v530_v44 = vld [vmem:[#allocation3 + $0x160] sm:$0xff]  ;;  %v528_v46 = vld [vmem:[#allocation3 + $0x150] sm:$0xff]  ;;  %v527_v47 = vld [vmem:[#allocation3 + $0x148] sm:$0xff] }
  0x44   : > { %1134 = vmatprep.subr.mxu0 %v278_v19  ;;  %1169 = vmatpush3.msra.mxu1 %v401_v22  ;;  %v526_v48 = vld [vmem:[#allocation3 + $0x140] sm:$0xff]  ;;  %v525_v49 = vld [vmem:[#allocation3 + $0x138] sm:$0xff]  ;;  %v524_v7 = vld [vmem:[#allocation3 + $0x130] sm:$0xff] }
  0x45   : > { %1135 = vmatpush3.msra.mxu0 %v278_v19  ;;  %1170 = vmatprep.subr.mxu1 %v400_v24  ;;  %v1007_v50 = vld [vmem:[%s1743_s2] ss:$0 sm:$0xff]  ;;  %v523_v8 = vld [vmem:[#allocation3 + $0x128] sm:$0xff]  ;;  %v521_v10 = vld [vmem:[#allocation3 + $0x118] sm:$0xff] }
  0x46   : > { %1136 = vmatprep.subr.mxu0 %v277_v21  ;;  %1171 = vmatpush3.msra.mxu1 %v400_v24  ;;  %v522_v9 = vld [vmem:[#allocation3 + $0x120] sm:$0xff]  ;;  %v520_v11 = vld [vmem:[#allocation3 + $0x110] sm:$0xff]  ;;  %v519_v12 = vld [vmem:[#allocation3 + $0x108] sm:$0xff] }
  0x47   : > { %1137 = vmatpush3.msra.mxu0 %v277_v21  ;;  %1172 = vmatprep.subr.mxu1 %v399_v26  ;;  %v518_v13 = vld [vmem:[#allocation3 + $0x100] sm:$0xff]  ;;  %v655_v14 = vld [vmem:[#allocation3 + $0x1f8] sm:$0xff]  ;;  %v654_v15 = vld [vmem:[#allocation3 + $0x1f0] sm:$0xff] }
  0x48   : > { %1138 = vmatprep.subr.mxu0 %v276_v23  ;;  %1173 = vmatpush3.msra.mxu1 %v399_v26  ;;  %v653_v16 = vld [vmem:[#allocation3 + $0x1e8] sm:$0xff]  ;;  %v652_v18 = vld [vmem:[#allocation3 + $0x1e0] sm:$0xff]  ;;  %v651_v19 = vld [vmem:[#allocation3 + $0x1d8] sm:$0xff] }
  0x49   : > { %1139 = vmatpush3.msra.mxu0 %v276_v23  ;;  %1174 = vmatprep.subr.mxu1 %v398_v28  ;;  %v650_v20 = vld [vmem:[#allocation3 + $0x1d0] sm:$0xff]  ;;  %v649_v21 = vld [vmem:[#allocation3 + $0x1c8] sm:$0xff]  ;;  %v648_v22 = vld [vmem:[#allocation3 + $0x1c0] sm:$0xff] }
  0x4a   : > { %1140 = vmatprep.subr.mxu0 %v275_v25  ;;  %1175 = vmatpush3.msra.mxu1 %v398_v28  ;;  %v647_v23 = vld [vmem:[#allocation3 + $0x1b8] sm:$0xff]  ;;  %v646_v24 = vld [vmem:[#allocation3 + $0x1b0] sm:$0xff] }
  0x4b   : > { %1141 = vmatpush3.msra.mxu0 %v275_v25  ;;  %1176 = vmatprep.subr.mxu1 %v397_v35  ;;  %v1009_v25 = vld [vmem:[%s1743_s2 + $0x1] ss:$0 sm:$0xff] }
  0x4c   : > { %1142 = vmatprep.subr.mxu0 %v274_v27  ;;  %1177 = vmatpush3.msra.mxu1 %v397_v35 }
  0x4d   : > { %1143 = vmatpush3.msra.mxu0 %v274_v27  ;;  %1178 = vmatprep.subr.mxu1 %v396_v36 }
  0x4e   : > { %1144 = vmatprep.subr.mxu0 %v273_v29  ;;  %1179 = vmatpush3.msra.mxu1 %v396_v36 }
  0x4f   : > { %1145 = vmatpush3.msra.mxu0 %v273_v29  ;;  %1180 = vmatprep.subr.mxu1 %v395_v37 }
  0x50   : > { %1146 = vmatprep.subr.mxu0 %v272_v30  ;;  %1181 = vmatpush3.msra.mxu1 %v395_v37 }
  0x51   : > { %1147 = vmatpush3.msra.mxu0 %v272_v30  ;;  %1182 = vmatprep.subr.mxu1 %v394_v38 }
  0x52   : > { %1148 = vmatprep.subr.mxu0 %v271_v31  ;;  %1183 = vmatpush3.msra.mxu1 %v394_v38 }
  0x53   : > { %1149 = vmatpush3.msra.mxu0 %v271_v31  ;;  %1184 = vmatprep.subr.mxu1 %v393_v39 }
  0x54   : > { %1151 = vmatmul.mubr.f32.vlgmr.msra.gmra.mxu0 %v1657_v32  ;;  %1185 = vmatpush3.msra.mxu1 %v393_v39 }
  0x55   : > { %1153 = vmatprep.mubr.f32.mxu0 %v1659_v33  ;;  %1186 = vmatprep.subr.mxu1 %v392_v40 }
  0x56   : > { %1187 = vmatpush3.msra.mxu1 %v392_v40  ;;  %1194 = vmatprep.subr.mxu0 %v533_v41 }
  0x57   : > { %1195 = vmatpush3.msra.mxu0 %v533_v41  ;;  %1232 = vmatprep.subr.mxu1 %v655_v14 }
  0x58   : > { %1154 = vmatmul.mubr.f32.gmra.mxu0 %v1663_v34  ;;  %1196 = vmatprep.subr.mxu0 %v532_v42 }
  0x59   : > { %1197 = vmatpush3.msra.mxu0 %v532_v42 }
  0x5a   : > { %1198 = vmatprep.subr.mxu0 %v531_v43 }
  0x5b   : > { %1199 = vmatpush3.msra.mxu0 %v531_v43 }
  0x5c   : > { %1200 = vmatprep.subr.mxu0 %v530_v44 }
  0x5d   : > { %1201 = vmatpush3.msra.mxu0 %v530_v44 }
  0x5e   : > { %1202 = vmatprep.subr.mxu0 %v529_v45 }
  0x5f   : > { %1203 = vmatpush3.msra.mxu0 %v529_v45 }
  0x60   : > { %1204 = vmatprep.subr.mxu0 %v528_v46 }
  0x61   : > { %1205 = vmatpush3.msra.mxu0 %v528_v46 }
  0x62   : > { %1206 = vmatprep.subr.mxu0 %v527_v47 }
  0x63   : > { %1207 = vmatpush3.msra.mxu0 %v527_v47 }
  0x64   : > { %1208 = vmatprep.subr.mxu0 %v526_v48 }
  0x65   : > { %1209 = vmatpush3.msra.mxu0 %v526_v48 }
  0x66   : > { %1210 = vmatprep.subr.mxu0 %v525_v49 }
  0x67   : > { %1211 = vmatpush3.msra.mxu0 %v525_v49 }
  0x68   : > { %1212 = vmatprep.subr.mxu0 %v524_v7 }
  0x69   : > { %1213 = vmatpush3.msra.mxu0 %v524_v7 }
  0x6a   : > { %1214 = vmatprep.subr.mxu0 %v523_v8 }
  0x6b   : > { %1215 = vmatpush3.msra.mxu0 %v523_v8 }
  0x6c   : > { %1216 = vmatprep.subr.mxu0 %v522_v9 }
  0x6d   : > { %1217 = vmatpush3.msra.mxu0 %v522_v9 }
  0x6e   : > { %1218 = vmatprep.subr.mxu0 %v521_v10 }
  0x6f   : > { %1219 = vmatpush3.msra.mxu0 %v521_v10 }
  0x70   : > { %1220 = vmatprep.subr.mxu0 %v520_v11 }
  0x71   : > { %1221 = vmatpush3.msra.mxu0 %v520_v11 }
  0x72   : > { %1222 = vmatprep.subr.mxu0 %v519_v12 }
  0x73   : > { %1223 = vmatpush3.msra.mxu0 %v519_v12 }
  0x74   : > { %1224 = vmatprep.subr.mxu0 %v518_v13 }
  0x75   : > { %1225 = vmatpush3.msra.mxu0 %v518_v13 }
 0x114   : > { %v1152_v51 = vpop.f32.mrf.mxu0 }
 0x115   : > { %v366_v52 = vadd.f32 %v1152_v51, %v1007_v50 }
 0x116   : > { %v360_v53 = vpop.f32.mrf.mxu0 }
 0x117   : > { %v380_v54 = vmax.f32 %v366_v52, 0.0  ;;  %v361_v55 = vadd.f32 %v1007_v50, %v360_v53  ;;  %v643_v53 = vld [vmem:[#allocation3 + $0x198] sm:$0xff] }
 0x118   : > { %v1155_v56 = vpop.f32.mrf.mxu0 }
 0x119   : > { %v379_v57 = vmax.f32 %v361_v55, 0.0  ;;  %v376_v58 = vadd.f32 %v1155_v56, %v1007_v50  ;;  %v384_v59 = vmul.f32 %v380_v54, %v380_v54  ;;  %v780_v55 = vld [vmem:[#allocation6 + $0x78] sm:$0xff]  ;;  %v779_v56 = vld [vmem:[#allocation6 + $0x70] sm:$0xff] }
 0x11a   : > { %v370_v60 = vpop.f32.mrf.mxu0  ;;  %1270 = vmatprep.subr.mxu0 %v780_v55 }
 0x11b   : > { %v382_v61 = vmax.f32 %v376_v58, 0.0  ;;  %v371_v62 = vadd.f32 %v1007_v50, %v370_v60  ;;  %v383_v63 = vmul.f32 %v379_v57, %v379_v57  ;;  %v388_v3 = vmul.f32 %v384_v59, %v380_v54  ;;  %v642_v54 = vld [vmem:[#allocation3 + $0x190] sm:$0xff]  ;;  %v777_v58 = vld [vmem:[#allocation6 + $0x60] sm:$0xff]  ;;  %v776_v59 = vld [vmem:[#allocation6 + $0x58] sm:$0xff] }
 0x11c   : > { %v775_v60 = vld [vmem:[#allocation6 + $0x50] sm:$0xff] }
 0x11d   : > { %v386_v0 = vmul.f32 %v382_v61, %v382_v61  ;;  %v381_v1 = vmax.f32 %v371_v62, 0.0  ;;  %v387_v2 = vmul.f32 %v383_v63, %v379_v57  ;;  %v778_v57 = vld [vmem:[#allocation6 + $0x68] sm:$0xff]  ;;  %v773_v62 = vld [vmem:[#allocation6 + $0x40] sm:$0xff]  ;;  %v772_v63 = vld [vmem:[#allocation6 + $0x38] sm:$0xff] }
 0x11f   : > { %v385_v4 = vmul.f32 %v381_v1, %v381_v1  ;;  %1188 = vmatprep.mubr.f32.mxu1 %v387_v2  ;;  %v390_v5 = vmul.f32 %v386_v0, %v382_v61  ;;  %v774_v61 = vld [vmem:[#allocation6 + $0x48] sm:$0xff]  ;;  %v1011_v0 = vld [vmem:[%s1743_s2 + $0x2] ss:$0 sm:$0xff] }
 0x120   : > { %1189 = vmatmul.mubr.f32.vlgmr.msra.gmra.mxu1 %v388_v3 }
 0x121   : > { %v389_v6 = vmul.f32 %v385_v4, %v381_v1  ;;  %1233 = vmatpush3.msra.mxu1 %v655_v14 }
 0x122   : > { %1234 = vmatprep.subr.mxu1 %v654_v15 }
 0x123   : > { %1191 = vmatprep.mubr.f32.mxu1 %v389_v6  ;;  %1235 = vmatpush3.msra.mxu1 %v654_v15 }
 0x124   : > { %1192 = vmatmul.mubr.f32.gmra.mxu1 %v390_v5  ;;  %1236 = vmatprep.subr.mxu1 %v653_v16 }
 0x125   : > { %1237 = vmatpush3.msra.mxu1 %v653_v16 }
 0x126   : > { %1238 = vmatprep.subr.mxu1 %v652_v18 }
 0x127   : > { %1239 = vmatpush3.msra.mxu1 %v652_v18 }
 0x128   : > { %1240 = vmatprep.subr.mxu1 %v651_v19 }
 0x129   : > { %1241 = vmatpush3.msra.mxu1 %v651_v19 }
 0x12a   : > { %1242 = vmatprep.subr.mxu1 %v650_v20 }
 0x12b   : > { %1243 = vmatpush3.msra.mxu1 %v650_v20 }
 0x12c   : > { %1244 = vmatprep.subr.mxu1 %v649_v21 }
 0x12d   : > { %1245 = vmatpush3.msra.mxu1 %v649_v21 }
 0x12e   : > { %1246 = vmatprep.subr.mxu1 %v648_v22 }
 0x12f   : > { %1247 = vmatpush3.msra.mxu1 %v648_v22  ;;  %v771_v22 = vld [vmem:[#allocation6 + $0x30] sm:$0xff] }
 0x130   : > { %1248 = vmatprep.subr.mxu1 %v647_v23 }
 0x131   : > { %1249 = vmatpush3.msra.mxu1 %v647_v23  ;;  %v770_v23 = vld [vmem:[#allocation6 + $0x28] sm:$0xff] }
 0x132   : > { %1250 = vmatprep.subr.mxu1 %v646_v24 }
 0x133   : > { %1251 = vmatpush3.msra.mxu1 %v646_v24  ;;  %v769_v24 = vld [vmem:[#allocation6 + $0x20] sm:$0xff] }
 0x1e0   : > { %v1190_v26 = vpop.f32.mrf.mxu1 }
 0x1e1   : > { %v488_v27 = vadd.f32 %v1190_v26, %v1009_v25  ;;  %v767_v26 = vld [vmem:[#allocation6 + $0x10] sm:$0xff] }
 0x1e2   : > { %v482_v28 = vpop.f32.mrf.mxu1 }
 0x1e3   : > { %v502_v29 = vmax.f32 %v488_v27, 0.0  ;;  %v483_v30 = vadd.f32 %v1009_v25, %v482_v28  ;;  %v766_v27 = vld [vmem:[#allocation6 + $0x8] sm:$0xff]  ;;  %v765_v28 = vld [vmem:[#allocation6] sm:$0xff] }
 0x1e4   : > { %v1193_v31 = vpop.f32.mrf.mxu1 }
 0x1e5   : > { %v506_v35 = vmul.f32 %v502_v29, %v502_v29  ;;  %v501_v36 = vmax.f32 %v483_v30, 0.0  ;;  %v498_v37 = vadd.f32 %v1193_v31, %v1009_v25 }
 0x1e6   : > { %v492_v38 = vpop.f32.mrf.mxu1 }
 0x1e7   : > { %v505_v39 = vmul.f32 %v501_v36, %v501_v36  ;;  %v504_v40 = vmax.f32 %v498_v37, 0.0  ;;  %v493_v41 = vadd.f32 %v1009_v25, %v492_v38  ;;  %v510_v42 = vmul.f32 %v506_v35, %v502_v29  ;;  %v768_v25 = vld [vmem:[#allocation6 + $0x18] sm:$0xff]  ;;  %v1013_v29 = vld [vmem:[%s1743_s2 + $0x3] ss:$0 sm:$0xff] }
 0x1e9   : > { %v509_v43 = vmul.f32 %v505_v39, %v501_v36  ;;  %v508_v44 = vmul.f32 %v504_v40, %v504_v40  ;;  %v503_v45 = vmax.f32 %v493_v41, 0.0  ;;  %v1676_v48 = vadd.f32 %v510_v42, %v1657_v32  ;;  %v644_v32 = vld [vmem:[#allocation3 + $0x1a0] sm:$0xff] }
 0x1eb   : > { %v507_v46 = vmul.f32 %v503_v45, %v503_v45  ;;  %v1673_v47 = vadd.f32 %v509_v43, %v1654_v17  ;;  %v512_v49 = vmul.f32 %v508_v44, %v504_v40  ;;  %v645_v17 = vld [vmem:[#allocation3 + $0x1a8] sm:$0xff] }
 0x1ec   : > { %1252 = vmatprep.subr.mxu1 %v645_v17 }
 0x1ed   : > { %v511_v50 = vmul.f32 %v507_v46, %v503_v45  ;;  %1226 = vmatprep.mubr.f32.mxu0 %v1673_v47  ;;  %v1684_v52 = vadd.f32 %v512_v49, %v1663_v34  ;;  %1253 = vmatpush3.msra.mxu1 %v645_v17  ;;  %v640_v34 = vld [vmem:[#allocation3 + $0x180] sm:$0xff] }
 0x1ee   : > { %1227 = vmatmul.mubr.f32.vlgmr.msra.gmra.mxu0 %v1676_v48  ;;  %1254 = vmatprep.subr.mxu1 %v644_v32 }
 0x1ef   : > { %v1681_v51 = vadd.f32 %v511_v50, %v1659_v33  ;;  %1255 = vmatpush3.msra.mxu1 %v644_v32  ;;  %v641_v33 = vld [vmem:[#allocation3 + $0x188] sm:$0xff]  ;;  %1271 = vmatpush3.msra.mxu0 %v780_v55 }
 0x1f0   : > { %1256 = vmatprep.subr.mxu1 %v643_v53  ;;  %1272 = vmatprep.subr.mxu0 %v779_v56 }
 0x1f1   : > { %1229 = vmatprep.mubr.f32.mxu0 %v1681_v51  ;;  %1257 = vmatpush3.msra.mxu1 %v643_v53 }
 0x1f2   : > { %1230 = vmatmul.mubr.f32.gmra.mxu0 %v1684_v52  ;;  %1258 = vmatprep.subr.mxu1 %v642_v54 }
 0x1f3   : > { %1259 = vmatpush3.msra.mxu1 %v642_v54  ;;  %1273 = vmatpush3.msra.mxu0 %v779_v56 }
 0x1f4   : > { %1260 = vmatprep.subr.mxu1 %v641_v33  ;;  %1274 = vmatprep.subr.mxu0 %v778_v57 }
 0x1f5   : > { %1261 = vmatpush3.msra.mxu1 %v641_v33  ;;  %1275 = vmatpush3.msra.mxu0 %v778_v57 }
 0x1f6   : > { %1262 = vmatprep.subr.mxu1 %v640_v34  ;;  %1276 = vmatprep.subr.mxu0 %v777_v58 }
 0x1f7   : > { %1263 = vmatpush3.msra.mxu1 %v640_v34  ;;  %1277 = vmatpush3.msra.mxu0 %v777_v58 }
 0x1f8   : > { %1308 = vmatprep.subr.mxu1 %v780_v55  ;;  %1278 = vmatprep.subr.mxu0 %v776_v59 }
 0x1f9   : > { %1279 = vmatpush3.msra.mxu0 %v776_v59 }
 0x1fa   : > { %1280 = vmatprep.subr.mxu0 %v775_v60 }
 0x1fb   : > { %1281 = vmatpush3.msra.mxu0 %v775_v60 }
 0x1fc   : > { %1282 = vmatprep.subr.mxu0 %v774_v61 }
 0x1fd   : > { %1283 = vmatpush3.msra.mxu0 %v774_v61 }
 0x1fe   : > { %1284 = vmatprep.subr.mxu0 %v773_v62 }
 0x1ff   : > { %1285 = vmatpush3.msra.mxu0 %v773_v62 }
 0x200   : > { %1286 = vmatprep.subr.mxu0 %v772_v63 }
 0x201   : > { %1287 = vmatpush3.msra.mxu0 %v772_v63 }
 0x202   : > { %1288 = vmatprep.subr.mxu0 %v771_v22 }
 0x203   : > { %1289 = vmatpush3.msra.mxu0 %v771_v22 }
 0x204   : > { %1290 = vmatprep.subr.mxu0 %v770_v23 }
 0x205   : > { %1291 = vmatpush3.msra.mxu0 %v770_v23 }
 0x206   : > { %1292 = vmatprep.subr.mxu0 %v769_v24 }
 0x207   : > { %1293 = vmatpush3.msra.mxu0 %v769_v24 }
 0x208   : > { %1294 = vmatprep.subr.mxu0 %v768_v25 }
 0x209   : > { %1295 = vmatpush3.msra.mxu0 %v768_v25 }
 0x20a   : > { %1296 = vmatprep.subr.mxu0 %v767_v26 }
 0x20b   : > { %1297 = vmatpush3.msra.mxu0 %v767_v26 }
 0x20c   : > { %1298 = vmatprep.subr.mxu0 %v766_v27 }
 0x20d   : > { %1299 = vmatpush3.msra.mxu0 %v766_v27 }
 0x20e   : > { %1300 = vmatprep.subr.mxu0 %v765_v28 }
 0x20f   : > { %1301 = vmatpush3.msra.mxu0 %v765_v28 }
 0x2ae   : > { %v1228_v1 = vpop.f32.mrf.mxu0 }
 0x2af   : > { %v614_v2 = vadd.f32 %v1228_v1, %v1011_v0 }
 0x2b0   : > { %v608_v3 = vpop.f32.mrf.mxu0 }
 0x2b1   : > { %v628_v4 = vmax.f32 %v614_v2, 0.0  ;;  %v609_v5 = vadd.f32 %v1011_v0, %v608_v3 }
 0x2b2   : > { %v1231_v6 = vpop.f32.mrf.mxu0 }
 0x2b3   : > { %v627_v7 = vmax.f32 %v609_v5, 0.0  ;;  %v624_v8 = vadd.f32 %v1231_v6, %v1011_v0  ;;  %v632_v9 = vmul.f32 %v628_v4, %v628_v4 }
 0x2b4   : > { %v618_v10 = vpop.f32.mrf.mxu0 }
 0x2b5   : > { %v631_v11 = vmul.f32 %v627_v7, %v627_v7  ;;  %v630_v12 = vmax.f32 %v624_v8, 0.0  ;;  %v619_v13 = vadd.f32 %v1011_v0, %v618_v10  ;;  %v636_v16 = vmul.f32 %v632_v9, %v628_v4 }
 0x2b7   : > { %v635_v14 = vmul.f32 %v631_v11, %v627_v7  ;;  %v629_v15 = vmax.f32 %v619_v13, 0.0  ;;  %v634_v18 = vmul.f32 %v630_v12, %v630_v12 }
 0x2b9   : > { %v633_v19 = vmul.f32 %v629_v15, %v629_v15  ;;  %1264 = vmatprep.mubr.f32.mxu1 %v635_v14  ;;  %v638_v21 = vmul.f32 %v634_v18, %v630_v12 }
 0x2ba   : > { %1265 = vmatmul.mubr.f32.vlgmr.msra.gmra.mxu1 %v636_v16 }
 0x2bb   : > { %v637_v20 = vmul.f32 %v633_v19, %v629_v15  ;;  %1324 = vmatpush3.msra.mxu1 %v780_v55 }
 0x2bc   : > { %1309 = vmatprep.subr.mxu1 %v779_v56 }
 0x2bd   : > { %1267 = vmatprep.mubr.f32.mxu1 %v637_v20  ;;  %1325 = vmatpush3.msra.mxu1 %v779_v56 }
 0x2be   : > { %1268 = vmatmul.mubr.f32.gmra.mxu1 %v638_v21  ;;  %1310 = vmatprep.subr.mxu1 %v778_v57 }
 0x2bf   : > { %1326 = vmatpush3.msra.mxu1 %v778_v57 }
 0x2c0   : > { %1311 = vmatprep.subr.mxu1 %v777_v58 }
 0x2c1   : > { %1327 = vmatpush3.msra.mxu1 %v777_v58  ;;  %v1014_v58 = vld [vmem:[%s1745_s4] ss:$0 sm:$0xff] }
 0x2c2   : > { %1312 = vmatprep.subr.mxu1 %v776_v59 }
 0x2c3   : > { %1328 = vmatpush3.msra.mxu1 %v776_v59 }
 0x2c4   : > { %1313 = vmatprep.subr.mxu1 %v775_v60 }
 0x2c5   : > { %1329 = vmatpush3.msra.mxu1 %v775_v60 }
 0x2c6   : > { %1314 = vmatprep.subr.mxu1 %v774_v61 }
 0x2c7   : > { %1330 = vmatpush3.msra.mxu1 %v774_v61 }
 0x2c8   : > { %1315 = vmatprep.subr.mxu1 %v773_v62 }
 0x2c9   : > { %1331 = vmatpush3.msra.mxu1 %v773_v62 }
 0x2ca   : > { %1316 = vmatprep.subr.mxu1 %v772_v63 }
 0x2cb   : > { %1332 = vmatpush3.msra.mxu1 %v772_v63 }
 0x2cc   : > { %1317 = vmatprep.subr.mxu1 %v771_v22 }
 0x2cd   : > { %1333 = vmatpush3.msra.mxu1 %v771_v22 }
 0x2ce   : > { %1318 = vmatprep.subr.mxu1 %v770_v23 }
 0x2cf   : > { %1334 = vmatpush3.msra.mxu1 %v770_v23 }
 0x2d0   : > { %1319 = vmatprep.subr.mxu1 %v769_v24 }
 0x2d1   : > { %1335 = vmatpush3.msra.mxu1 %v769_v24 }
 0x2d2   : > { %1320 = vmatprep.subr.mxu1 %v768_v25 }
 0x2d3   : > { %1336 = vmatpush3.msra.mxu1 %v768_v25 }
 0x2d4   : > { %1321 = vmatprep.subr.mxu1 %v767_v26 }
 0x2d5   : > { %1337 = vmatpush3.msra.mxu1 %v767_v26 }
 0x2d6   : > { %1322 = vmatprep.subr.mxu1 %v766_v27 }
 0x2d7   : > { %1338 = vmatpush3.msra.mxu1 %v766_v27 }
 0x2d8   : > { %1323 = vmatprep.subr.mxu1 %v765_v28 }
 0x2d9   : > { %1339 = vmatpush3.msra.mxu1 %v765_v28 }
 0x37a   : > { %v1266_v30 = vpop.f32.mrf.mxu1 }
 0x37b   : > { %v736_v31 = vadd.f32 %v1266_v30, %v1013_v29 }
 0x37c   : > { %v730_v35 = vpop.f32.mrf.mxu1 }
 0x37d   : > { %v750_v36 = vmax.f32 %v736_v31, 0.0  ;;  %v731_v37 = vadd.f32 %v1013_v29, %v730_v35 }
 0x37e   : > { %v1269_v38 = vpop.f32.mrf.mxu1 }
 0x37f   : > { %v754_v39 = vmul.f32 %v750_v36, %v750_v36  ;;  %v749_v40 = vmax.f32 %v731_v37, 0.0  ;;  %v746_v41 = vadd.f32 %v1269_v38, %v1013_v29 }
 0x380   : > { %v740_v42 = vpop.f32.mrf.mxu1 }
 0x381   : > { %v753_v43 = vmul.f32 %v749_v40, %v749_v40  ;;  %v752_v44 = vmax.f32 %v746_v41, 0.0  ;;  %v741_v45 = vadd.f32 %v1013_v29, %v740_v42  ;;  %v758_v46 = vmul.f32 %v754_v39, %v750_v36 }
 0x383   : > { %v757_v49 = vmul.f32 %v753_v43, %v749_v40  ;;  %v756_v50 = vmul.f32 %v752_v44, %v752_v44  ;;  %v751_v17 = vmax.f32 %v741_v45, 0.0  ;;  %v762_v54 = vadd.f32 %v758_v46, %v1676_v48 }
 0x385   : > { %v755_v32 = vmul.f32 %v751_v17, %v751_v17  ;;  %v761_v53 = vadd.f32 %v757_v49, %v1673_v47  ;;  %v760_v33 = vmul.f32 %v756_v50, %v752_v44 }
 0x387   : > { %v759_v34 = vmul.f32 %v755_v32, %v751_v17  ;;  %1302 = vmatprep.mubr.f32.mxu0 %v761_v53  ;;  %v764_v56 = vadd.f32 %v760_v33, %v1684_v52 }
 0x388   : > { %1303 = vmatmul.mubr.f32.vlgmr.msra.gmra.mxu0 %v762_v54 }
 0x389   : > { %v763_v55 = vadd.f32 %v759_v34, %v1681_v51 }
 0x38b   : > { %1305 = vmatprep.mubr.f32.mxu1 %v763_v55 }
 0x38c   : > { %1306 = vmatmul.mubr.f32.vlgmr.msra.gmra.mxu1 %v764_v56 }
 0x448   : > { %v1304_v57 = vpop.f32.mrf.mxu0 }
 0x449   : > { %v860_v60 = vadd.f32 %v1304_v57, %v1014_v58 }
 0x44a   : > { %v854_v47 = vpop.f32.mrf.mxu0 }
 0x44b   : > { %v855_v59 = vadd.f32 %v1014_v58, %v854_v47 }
 0x44c   : > { %v1307_v48 = vpop.f32.mrf.mxu1 }
 0x44d   : > { %873 = vxpose.xlu0.b32.start [1/4] (short) (narrow) %v855_v59, 8  ;;  %v870_v51 = vadd.f32 %v1307_v48, %v1014_v58 }
 0x44e   : > { %v864_v61 = vpop.f32.mrf.mxu1 }
 0x44f   : > { %v865_v62 = vadd.f32 %v1014_v58, %v864_v61 }
 0x451   : > { %874 = vxpose.xlu0.b32.cont [2/4] (short) (narrow) %v860_v60, 8 }
 0x455   : > { %875 = vxpose.xlu0.b32.cont [3/4] (short) (narrow) %v865_v62, 8 }
 0x459   : > { %876 = vxpose.xlu0.b32.end [4/4] (short) (narrow) %v870_v51, 8 }
 0x4c9   : > { %v889_v52 = vpop.trf.xlu0 }
 0x4ca   : > { %906 = vst.msk [vmem:[%s247_s26] sm:$0x1] %vm905_vm1, %v889_v52 }
 0x4cb   : > { %1468 = shalt.err (!%p1465_p3)
}
 0x4cc   : > { %s1469_s13 = scalar_lea.hbm %s1706_s8, 16  ;;  %s1473_s16 = scalar_lea.hbm %s1746_s5, 32 }
 0x4cd   : > { %p1470_p2 = scmp.ne.s32.totalorder %s1706_s8, %s1469_s13  ;;  %p1474_p7 = scmp.lt.s32.totalorder %s1706_s8, %s1746_s5 }
 0x4ce   : > { %p1475_p6 = scmp.lt.s32.totalorder %s1473_s16, %s1469_s13 }
 0x4cf   : > { %p1471_p4 = pnand %p1470_p2, %p1599_p5 }
 0x4d0   : > { %p1476_p9 = por %p1475_p6, %p1474_p7 }
 0x4d1   : > { %p1472_p13 = pneg %p1471_p4 }
 0x4d3   : > { %p1477_p10 = pnand %p1476_p9, %p1472_p13 }
 0x4d5   : > { %1480 = shalt.err (!%p1477_p10)
}
 0x4d6   : > { %1348 = dma.vmem_to_hbm [thread:$0]  (%p1599_p5), %s921_s30, 16, %s1706_s8, %s908_s9  }
 0x4d7 PF: > { %p1365_p12 = scmp.ge.s32.totalorder %s1523_s21, 2  ;;  %s932_s25 = sand.u32 1, %s1511_s18  }
 0x4d8   : > { %p1756_p8 = scmp.ne.s32.totalorder %s1749_s29, 0  ;;  %s933_s26 = scalar_lea.sflag [#allocation5], %s932_s25 }
 0x4da   : > { %p1358_p11 = pnand %p1365_p12, %p1756_p8 }
 0x4dc   : > { %p1359_p0 = pneg %p1358_p11 }
 0x4de   : > { %1506 = dma.done.wait (%p1359_p0), %s933_s26, 16  }
 0x4df   : > { %1508 = vsyncadd (%p1359_p0), %s933_s26, 4294967280  ;;  %p17_p1 = scmp.ge.s32.totalorder %s1586_s24, 4   ;;  %s1757_s18 = smov %s1515_s19 }
 0x4e0   : > { %s1758_s19 = smov %s1519_s20  ;;  %s1759_s20 = smov %s1597_s27 }
 0x4e1   : > { %s1760_s21 = smov %s1586_s24  ;;  %19 = sbr.rel (!%p17_p1) target bundleno = 5 (0x5), region = 90 }
 0x4e6   :  { %937 = vsyncpa [#allocation4], 1 }
 0x4e7   :  { %939 = vsyncpa [#allocation4 + $0x1], 1 }
 0x4e8   :  { %940 = vsyncpa [#allocation7], 1 }
 0x4e9   :  { %941 = vsyncpa [#allocation5], 1 }
 0x4ea   :  { %943 = vsyncpa [#allocation5 + $0x1], 1 }

</bundles_post_ra>
